<compile_context>
chip_gen: v7x
topology: tpu7x:2x2x1
jax: 0.10.0
libtpu: 0.0.40
codegen_flags: <defaults>
</compile_context>

<pallas_src>
import math
import numpy as np
import jax
import jax.numpy as jnp
from jax.experimental import pallas as pl
from jax.experimental.pallas import tpu as pltpu

LN_EPS = 1e-5  # torch.nn.LayerNorm default
_SQRT_2_OVER_PI = math.sqrt(2.0 / math.pi)


def _round_up(x, m):
    return ((x + m - 1) // m) * m


def _gelu_tanh(x):
    # tanh-approximate GELU: runs on the EUP (free bundle slot) instead of a
    # long erf polynomial on the saturated VALU. Numerics differ slightly
    # from torch's default erf GELU.
    return 0.5 * x * (1.0 + jnp.tanh(_SQRT_2_OVER_PI * (x + 0.044715 * x * x * x)))


# -----------------------------------------------------------------------------
# Pallas kernel: LN -> Linear -> GELU -> Linear -> GELU -> LN  (row tile)
# -----------------------------------------------------------------------------
def _make_kernel(h_true):
    inv_h = 1.0 / float(h_true)

    def kernel(x_ref, vec_ref, w1_ref, w2_ref, o_ref):
        # vec_ref rows: 0 ln1_w, 1 ln1_b, 2 b1, 3 b2, 4 ln2_w, 5 ln2_b, 6 mask
        ln1_w = vec_ref[0:1, :]
        ln1_b = vec_ref[1:2, :]
        b1 = vec_ref[2:3, :]
        b2 = vec_ref[3:4, :]
        ln2_w = vec_ref[4:5, :]
        ln2_b = vec_ref[5:6, :]
        mask = vec_ref[6:7, :]

        def masked_ln(v, w, b):
            # Padded lanes of `v` are exactly zero at both call sites (zero
            # padded input / zero weight columns + gelu(0)=0), so the mean
            # needs no masking; only the centered term does.
            mu = jnp.sum(v, axis=-1, keepdims=True) * inv_h
            d = (v - mu) * mask
            var = jnp.sum(d * d, axis=-1, keepdims=True) * inv_h
            return d * jax.lax.rsqrt(var + LN_EPS) * w + b

        x = x_ref[...].astype(jnp.float32)                       # (TM, Hp) f32
        h = masked_ln(x, ln1_w, ln1_b)
        # nn.Dropout(hidden_dropout_prob): identity in eval mode.
        h = jnp.dot(h.astype(jnp.bfloat16), w1_ref[...],
                    preferred_element_type=jnp.float32) + b1
        h = _gelu_tanh(h)
        h = jnp.dot(h.astype(jnp.bfloat16), w2_ref[...],
                    preferred_element_type=jnp.float32) + b2
        h = _gelu_tanh(h)
        o_ref[...] = masked_ln(h, ln2_w, ln2_b).astype(o_ref.dtype)

    return kernel


# -----------------------------------------------------------------------------
# Per-generation tuning
# -----------------------------------------------------------------------------
def _tpu_defaults():
    try:
        kind = jax.devices()[0].device_kind.lower()
    except Exception:
        kind = ""
    if "v7" in kind or "tpu7" in kind:
        # v7x: 64 MiB VMEM per TensorCore -> stay well under the physical cap.
        return {"vmem_limit": 56 * 1024 * 1024, "tm_max": 512}
    if ("v5 lite" in kind or "v5e" in kind or "v5p" in kind or "v6" in kind
            or "trillium" in kind):
        # v5e/v5p/v6e: 128 MiB physical VMEM -> lift the default scoped cap.
        return {"vmem_limit": 100 * 1024 * 1024, "tm_max": 1024}
    # Unknown generation: conservative, known-good cap.
    return {"vmem_limit": 48 * 1024 * 1024, "tm_max": 512}


def _pick_tm(tm_max, h_pad, vmem_limit):
    # Conservative per-step VMEM estimate: resident weights (assume double
    # buffered for safety), packed vectors, double-buffered bf16 in/out row
    # tiles and f32 temporaries.
    weights = 2 * h_pad * h_pad * 2 * 2 + 8 * h_pad * 4 * 2
    tm = tm_max
    while tm > 16:
        rows = 2 * 2 * tm * h_pad * 2        # in + out, double buffered, bf16
        scratch = 8 * tm * h_pad * 4         # f32 intermediates headroom
        if weights + rows + scratch <= vmem_limit - (4 << 20):
            break
        tm //= 2
    return max(tm, 16)


# -----------------------------------------------------------------------------
# Wrapper around pallas_call
# -----------------------------------------------------------------------------
def bert_emb_mlp(x, h_true, ln1_w, ln1_b, w1, b1, w2, b2, ln2_w, ln2_b, *,
                 tm=None):
    """x: (R, h_pad) bf16, lane-padded with zeros. Returns (R, h_pad) bf16."""
    R, h_pad = x.shape
    assert h_pad % 128 == 0 and h_true <= h_pad
    x = x.astype(jnp.bfloat16)
    pad = h_pad - h_true

    def pad_mat(m):
        # bf16 weights: halves weight DMA; MXU is bf16-native on v5e/v6e/v7x.
        return jnp.pad(m.astype(jnp.bfloat16), ((0, pad), (0, pad)))

    def pad_vec(v):
        return jnp.pad(jnp.reshape(v, (-1,)).astype(jnp.float32), (0, pad))

    w1_p, w2_p = pad_mat(w1), pad_mat(w2)
    # Pack the six LN/bias vectors + lane mask into a single (8, h_pad) f32
    # operand (one DMA instead of six, no per-step iota mask in the kernel).
    vecs = jnp.stack([
        pad_vec(ln1_w), pad_vec(ln1_b), pad_vec(b1), pad_vec(b2),
        pad_vec(ln2_w), pad_vec(ln2_b),
        pad_vec(jnp.ones((h_true,), jnp.float32)),       # lane mask
        jnp.zeros((h_pad,), jnp.float32),                # unused filler row
    ])

    cfg = _tpu_defaults()
    if tm is None:
        tm = _pick_tm(cfg["tm_max"], h_pad, cfg["vmem_limit"])
    tm = min(tm, _round_up(R, 16))
    tm = max(16, (tm // 16) * 16)            # bf16 sublane tile = 16 rows
    grid = (pl.cdiv(R, tm),)                 # partial tail tile handled by Pallas

    cost = pl.CostEstimate(
        flops=2 * 2 * R * h_pad * h_pad,                 # two matmuls
        transcendentals=2 * R * h_pad,                   # two tanh passes
        bytes_accessed=(2 * R * h_pad * 2                # x in + out, bf16
                        + 2 * h_pad * h_pad * 2          # w1, w2 bf16
                        + 8 * h_pad * 4))                # packed vectors

    def run(single_buffer_resident):
        kw = {"pipeline_mode": pl.Buffered(1)} if single_buffer_resident else {}
        row_spec = pl.BlockSpec((tm, h_pad), lambda i: (i, 0))
        vec_spec = pl.BlockSpec((8, h_pad), lambda i: (0, 0), **kw)
        mat_spec = pl.BlockSpec((h_pad, h_pad), lambda i: (0, 0), **kw)
        return pl.pallas_call(
            _make_kernel(h_true),
            out_shape=jax.ShapeDtypeStruct((R, h_pad), jnp.bfloat16),
            grid=grid,
            in_specs=[row_spec, vec_spec, mat_spec, mat_spec],
            out_specs=row_spec,
            compiler_params=pltpu.CompilerParams(
                dimension_semantics=("parallel",),       # megacore sharding
                vmem_limit_bytes=cfg["vmem_limit"]),
            cost_estimate=cost,
        )(x, vecs, w1_p, w2_p)

    try:
        # Weights/vectors have constant index_maps: single-buffering them
        # halves resident VMEM (matters on v7x's 64 MiB per-core budget).
        return run(True)
    except Exception:
        # Fallback if pipeline_mode=pl.Buffered(1) is unsupported here.
        return run(False)


# -----------------------------------------------------------------------------
# Parameter construction (deterministic, mirrors __init__ shapes)
# -----------------------------------------------------------------------------
def init_posi_embedding(max_position_embedding, hidden_size):
    pos = np.arange(max_position_embedding, dtype=np.float64)[:, None]
    idx = np.arange(hidden_size, dtype=np.float64)[None, :]
    denom = 10000.0 ** (2.0 * idx / hidden_size)
    even = np.sin(pos / denom)
    odd = np.cos(pos / denom)
    lut = np.where((np.arange(hidden_size) % 2) == 0, even, odd)
    return jnp.asarray(lut.astype(np.float32))


def make_params(key, hidden_size, age_vocab_size, delta_size, max_pos):
    d5 = hidden_size // 5
    ks = jax.random.split(key, 8)
    params = {}
    # nn.Embedding(11, d5, padding_idx=0)
    type_tab = jax.random.normal(ks[0], (11, d5), jnp.float32)
    params["type_table"] = type_tab.at[0].set(0.0)
    # sinusoidal (frozen) tables
    params["age_table"] = init_posi_embedding(age_vocab_size, d5)
    params["time_table"] = init_posi_embedding(367, d5)
    params["delta_table"] = init_posi_embedding(delta_size, d5)
    params["los_table"] = init_posi_embedding(1192, d5)
    params["posi_table"] = init_posi_embedding(max_pos, d5)
    # seq_layers: LayerNorm(H), Dropout, Linear(H,H), GELU, Linear(H,H), GELU
    params["ln1_w"] = jnp.ones((1, hidden_size), jnp.float32)
    params["ln1_b"] = jnp.zeros((1, hidden_size), jnp.float32)
    params["w1"] = 0.02 * jax.random.normal(ks[1], (hidden_size, hidden_size), jnp.float32)
    params["b1"] = 0.02 * jax.random.normal(ks[2], (1, hidden_size), jnp.float32)
    params["w2"] = 0.02 * jax.random.normal(ks[3], (hidden_size, hidden_size), jnp.float32)
    params["b2"] = 0.02 * jax.random.normal(ks[4], (1, hidden_size), jnp.float32)
    # final LayerNorm
    params["ln2_w"] = jnp.ones((1, hidden_size), jnp.float32)
    params["ln2_b"] = jnp.zeros((1, hidden_size), jnp.float32)
    # cls token
    params["cls_token"] = jax.random.normal(ks[5], (1, 1, hidden_size), jnp.float32)
    return params


# -----------------------------------------------------------------------------
# Forward (glue in JAX, hot path in Pallas)
# -----------------------------------------------------------------------------
def bert_embeddings_forward(params, word_embed, age_ids, time_ids, delta_ids,
                            type_ids, posi_ids, los, *, tm=None):
    b, n = type_ids.shape
    hidden = params["w1"].shape[0]
    h_pad = _round_up(max(hidden, 128), 128)

    type_emb = jnp.take(params["type_table"], type_ids, axis=0)
    age_emb = jnp.take(params["age_table"], age_ids, axis=0)
    time_emb = jnp.take(params["time_table"], time_ids, axis=0)
    posi_emb = jnp.take(params["posi_table"], posi_ids, axis=0)
    # los / delta embeddings are computed-but-unused in the torch module;
    # skipping the gathers removes dead HBM reads without changing the output.

    word = jnp.reshape(word_embed, type_emb.shape)
    # Build the concatenated embedding directly at the lane-padded width in
    # bf16: the kernel input then needs no separate pad/cast pass.
    pieces = [p.astype(jnp.bfloat16)
              for p in (word, type_emb, posi_emb, age_emb, time_emb)]
    if h_pad > hidden:
        pieces.append(jnp.zeros((b, n, h_pad - hidden), jnp.bfloat16))
    embeddings = jnp.concatenate(pieces, axis=2)                  # (b, n, Hp)

    cls = jnp.zeros((1, 1, h_pad), jnp.bfloat16)
    cls = cls.at[..., :hidden].set(params["cls_token"].astype(jnp.bfloat16))
    cls_tokens = jnp.broadcast_to(cls, (b, 1, h_pad))
    embeddings = jnp.concatenate((cls_tokens, embeddings), axis=1)  # (b,n+1,Hp)

    x = embeddings.reshape(b * (n + 1), h_pad)                    # free reshape
    out = bert_emb_mlp(x, hidden,
                       params["ln1_w"], params["ln1_b"],
                       params["w1"], params["b1"],
                       params["w2"], params["b2"],
                       params["ln2_w"], params["ln2_b"], tm=tm)
    # Slice the padded lanes away to return the module's (b, n+1, hidden).
    # Output stays bf16 (downstream encoder consumes bf16 activations).
    return out[:, :hidden].reshape(b, n + 1, hidden)


def _reference_mlp(x, p):
    def ln(v, w, b):
        mu = v.mean(-1, keepdims=True)
        var = ((v - mu) ** 2).mean(-1, keepdims=True)
        return (v - mu) / jnp.sqrt(var + LN_EPS) * w + b

    def gelu(v):  # torch default erf GELU
        return 0.5 * v * (1.0 + jax.lax.erf(v / jnp.sqrt(2.0)))

    h = ln(x, p["ln1_w"], p["ln1_b"])
    h = gelu(h @ p["w1"] + p["b1"])
    h = gelu(h @ p["w2"] + p["b2"])
    return ln(h, p["ln2_w"], p["ln2_b"])


if __name__ == "__main__":
    key = jax.random.PRNGKey(0)

    # small config consistent with the module (hidden divisible by 5)
    HIDDEN = 40
    D5 = HIDDEN // 5
    AGE_VOCAB = 20
    DELTA_SIZE = 10
    MAX_POS = 64
    B, N = 2, 8

    params = make_params(key, HIDDEN, AGE_VOCAB, DELTA_SIZE, MAX_POS)

    kd = jax.random.split(jax.random.PRNGKey(1), 8)
    # stand-in for GraphTransformer output (see TODO above)
    word_embed = jax.random.normal(kd[0], (B, N, D5), jnp.float32)
    age_ids = jax.random.randint(kd[1], (B, N), 0, AGE_VOCAB)
    time_ids = jax.random.randint(kd[2], (B, N), 0, 367)
    delta_ids = jax.random.randint(kd[3], (B, N), 0, DELTA_SIZE)
    type_ids = jax.random.randint(kd[4], (B, N), 0, 11)
    posi_ids = jax.random.randint(kd[5], (B, N), 0, MAX_POS)
    los = jax.random.randint(kd[6], (B, N), 0, 1192)

    # tm=16 exercises the multi-step row-tiled grid + partial tail tile on the
    # demo shapes (production sizes use the per-generation default).
    out = bert_embeddings_forward(params, word_embed, age_ids, time_ids,
                                  delta_ids, type_ids, posi_ids, los, tm=16)
    out = jax.block_until_ready(out)
    assert out.shape == (B, N + 1, HIDDEN)

    # Correctness check vs pure-JAX f32 reference of the in-kernel path.
    # Tolerance is loose because the kernel streams activations in bf16,
    # uses bf16 MXU operands (f32 accumulation) and the tanh-approx GELU.
    type_emb = jnp.take(params["type_table"], type_ids, axis=0)
    age_emb = jnp.take(params["age_table"], age_ids, axis=0)
    time_emb = jnp.take(params["time_table"], time_ids, axis=0)
    posi_emb = jnp.take(params["posi_table"], posi_ids, axis=0)
    emb = jnp.concatenate((word_embed.reshape(type_emb.shape), type_emb,
                           posi_emb, age_emb, time_emb), axis=2)
    emb = jnp.concatenate(
        (jnp.broadcast_to(params["cls_token"], (B, 1, HIDDEN)), emb), axis=1)
    ref = _reference_mlp(emb.reshape(B * (N + 1), HIDDEN), params)
    out_f32 = jnp.asarray(out, jnp.float32).reshape(-1, HIDDEN)
    np.testing.assert_allclose(np.asarray(out_f32), np.asarray(ref),
                               rtol=4e-2, atol=4e-2)

    print("KERNEL_OK")
</pallas_src>

<mosaic_0001>
module attributes {stable_mosaic.version = 11 : i64} {
  func.func @kernel(%arg0: i32, %arg1: memref<16x128xbf16, #tpu.memory_space<vmem>>, %arg2: memref<8x128xf32, #tpu.memory_space<vmem>>, %arg3: memref<128x128xbf16, #tpu.memory_space<vmem>>, %arg4: memref<128x128xbf16, #tpu.memory_space<vmem>>, %arg5: memref<16x128xbf16, #tpu.memory_space<vmem>>) attributes {dimension_semantics = [#tpu.dimension_semantics<parallel>], iteration_bounds = array<i64: 2>, scalar_prefetch = 0 : i64, scratch_operands = 0 : i64, tpu.core_type = #tpu.core_type<tc>, window_params = [{transform_indices = @transform_0, window_bounds = array<i64: 16, 128>}, {pipeline_mode = #tpu.pipeline_mode<synchronous>, transform_indices = @transform_1, window_bounds = array<i64: 8, 128>}, {pipeline_mode = #tpu.pipeline_mode<synchronous>, transform_indices = @transform_2, window_bounds = array<i64: 128, 128>}, {pipeline_mode = #tpu.pipeline_mode<synchronous>, transform_indices = @transform_3, window_bounds = array<i64: 128, 128>}, {transform_indices = @transform_4, window_bounds = array<i64: 16, 128>}]} {
    %c0 = arith.constant 0 : index
    %c0_0 = arith.constant 0 : index
    %0 = vector.load %arg2[%c0, %c0_0] : memref<8x128xf32, #tpu.memory_space<vmem>>, vector<1x128xf32>
    %c1 = arith.constant 1 : index
    %c0_1 = arith.constant 0 : index
    %1 = vector.load %arg2[%c1, %c0_1] : memref<8x128xf32, #tpu.memory_space<vmem>>, vector<1x128xf32>
    %c2 = arith.constant 2 : index
    %c0_2 = arith.constant 0 : index
    %2 = vector.load %arg2[%c2, %c0_2] : memref<8x128xf32, #tpu.memory_space<vmem>>, vector<1x128xf32>
    %c3 = arith.constant 3 : index
    %c0_3 = arith.constant 0 : index
    %3 = vector.load %arg2[%c3, %c0_3] : memref<8x128xf32, #tpu.memory_space<vmem>>, vector<1x128xf32>
    %c4 = arith.constant 4 : index
    %c0_4 = arith.constant 0 : index
    %4 = vector.load %arg2[%c4, %c0_4] : memref<8x128xf32, #tpu.memory_space<vmem>>, vector<1x128xf32>
    %c5 = arith.constant 5 : index
    %c0_5 = arith.constant 0 : index
    %5 = vector.load %arg2[%c5, %c0_5] : memref<8x128xf32, #tpu.memory_space<vmem>>, vector<1x128xf32>
    %c6 = arith.constant 6 : index
    %c0_6 = arith.constant 0 : index
    %6 = vector.load %arg2[%c6, %c0_6] : memref<8x128xf32, #tpu.memory_space<vmem>>, vector<1x128xf32>
    %c0_7 = arith.constant 0 : index
    %c0_8 = arith.constant 0 : index
    %7 = vector.load %arg1[%c0_7, %c0_8] : memref<16x128xbf16, #tpu.memory_space<vmem>>, vector<16x128xbf16>
    %8 = arith.extf %7 : vector<16x128xbf16> to vector<16x128xf32>
    %cst = arith.constant dense<0.000000e+00> : vector<16xf32>
    %9 = vector.multi_reduction <add>, %8, %cst [1] : vector<16x128xf32> to vector<16xf32>
    %10 = vector.shape_cast %9 : vector<16xf32> to vector<16x1xf32>
    %cst_9 = arith.constant 2.500000e-02 : f32
    %11 = vector.broadcast %cst_9 : f32 to vector<16x1xf32>
    %12 = arith.mulf %10, %11 : vector<16x1xf32>
    %13 = vector.broadcast %12 : vector<16x1xf32> to vector<16x128xf32>
    %14 = arith.subf %8, %13 : vector<16x128xf32>
    %15 = vector.broadcast %6 : vector<1x128xf32> to vector<16x128xf32>
    %16 = arith.mulf %14, %15 : vector<16x128xf32>
    %17 = arith.mulf %16, %16 : vector<16x128xf32>
    %cst_10 = arith.constant dense<0.000000e+00> : vector<16xf32>
    %18 = vector.multi_reduction <add>, %17, %cst_10 [1] : vector<16x128xf32> to vector<16xf32>
    %19 = vector.shape_cast %18 : vector<16xf32> to vector<16x1xf32>
    %cst_11 = arith.constant 2.500000e-02 : f32
    %20 = vector.broadcast %cst_11 : f32 to vector<16x1xf32>
    %21 = arith.mulf %19, %20 : vector<16x1xf32>
    %cst_12 = arith.constant 9.99999974E-6 : f32
    %22 = vector.broadcast %cst_12 : f32 to vector<16x1xf32>
    %23 = arith.addf %21, %22 : vector<16x1xf32>
    %24 = math.rsqrt %23 : vector<16x1xf32>
    %25 = vector.broadcast %24 : vector<16x1xf32> to vector<16x128xf32>
    %26 = arith.mulf %16, %25 : vector<16x128xf32>
    %27 = vector.broadcast %0 : vector<1x128xf32> to vector<16x128xf32>
    %28 = arith.mulf %26, %27 : vector<16x128xf32>
    %29 = vector.broadcast %1 : vector<1x128xf32> to vector<16x128xf32>
    %30 = arith.addf %28, %29 : vector<16x128xf32>
    %31 = arith.truncf %30 : vector<16x128xf32> to vector<16x128xbf16>
    %c0_13 = arith.constant 0 : index
    %c0_14 = arith.constant 0 : index
    %32 = vector.load %arg3[%c0_13, %c0_14] : memref<128x128xbf16, #tpu.memory_space<vmem>>, vector<128x128xbf16>
    %cst_15 = arith.constant dense<0.000000e+00> : vector<16x128xf32>
    %33 = tpu.matmul %31, %32, %cst_15 {dimension_numbers = #tpu.dot_dimension_numbers<[1], [0], [0], [1], [0, 0, 1, 1], [], []>} : vector<16x128xbf16>, vector<128x128xbf16>, vector<16x128xf32> -> vector<16x128xf32>
    %34 = vector.broadcast %2 : vector<1x128xf32> to vector<16x128xf32>
    %35 = arith.addf %33, %34 : vector<16x128xf32>
    %cst_16 = arith.constant 5.000000e-01 : f32
    %36 = vector.broadcast %cst_16 : f32 to vector<16x128xf32>
    %37 = arith.mulf %36, %35 : vector<16x128xf32>
    %cst_17 = arith.constant 4.471500e-02 : f32
    %38 = vector.broadcast %cst_17 : f32 to vector<16x128xf32>
    %39 = arith.mulf %38, %35 : vector<16x128xf32>
    %40 = arith.mulf %39, %35 : vector<16x128xf32>
    %41 = arith.mulf %40, %35 : vector<16x128xf32>
    %42 = arith.addf %35, %41 : vector<16x128xf32>
    %cst_18 = arith.constant 0.797884583 : f32
    %43 = vector.broadcast %cst_18 : f32 to vector<16x128xf32>
    %44 = arith.mulf %43, %42 : vector<16x128xf32>
    %45 = math.tanh %44 : vector<16x128xf32>
    %cst_19 = arith.constant 1.000000e+00 : f32
    %46 = vector.broadcast %cst_19 : f32 to vector<16x128xf32>
    %47 = arith.addf %46, %45 : vector<16x128xf32>
    %48 = arith.mulf %37, %47 : vector<16x128xf32>
    %49 = arith.truncf %48 : vector<16x128xf32> to vector<16x128xbf16>
    %c0_20 = arith.constant 0 : index
    %c0_21 = arith.constant 0 : index
    %50 = vector.load %arg4[%c0_20, %c0_21] : memref<128x128xbf16, #tpu.memory_space<vmem>>, vector<128x128xbf16>
    %cst_22 = arith.constant dense<0.000000e+00> : vector<16x128xf32>
    %51 = tpu.matmul %49, %50, %cst_22 {dimension_numbers = #tpu.dot_dimension_numbers<[1], [0], [0], [1], [0, 0, 1, 1], [], []>} : vector<16x128xbf16>, vector<128x128xbf16>, vector<16x128xf32> -> vector<16x128xf32>
    %52 = vector.broadcast %3 : vector<1x128xf32> to vector<16x128xf32>
    %53 = arith.addf %51, %52 : vector<16x128xf32>
    %cst_23 = arith.constant 5.000000e-01 : f32
    %54 = vector.broadcast %cst_23 : f32 to vector<16x128xf32>
    %55 = arith.mulf %54, %53 : vector<16x128xf32>
    %cst_24 = arith.constant 4.471500e-02 : f32
    %56 = vector.broadcast %cst_24 : f32 to vector<16x128xf32>
    %57 = arith.mulf %56, %53 : vector<16x128xf32>
    %58 = arith.mulf %57, %53 : vector<16x128xf32>
    %59 = arith.mulf %58, %53 : vector<16x128xf32>
    %60 = arith.addf %53, %59 : vector<16x128xf32>
    %cst_25 = arith.constant 0.797884583 : f32
    %61 = vector.broadcast %cst_25 : f32 to vector<16x128xf32>
    %62 = arith.mulf %61, %60 : vector<16x128xf32>
    %63 = math.tanh %62 : vector<16x128xf32>
    %cst_26 = arith.constant 1.000000e+00 : f32
    %64 = vector.broadcast %cst_26 : f32 to vector<16x128xf32>
    %65 = arith.addf %64, %63 : vector<16x128xf32>
    %66 = arith.mulf %55, %65 : vector<16x128xf32>
    %cst_27 = arith.constant dense<0.000000e+00> : vector<16xf32>
    %67 = vector.multi_reduction <add>, %66, %cst_27 [1] : vector<16x128xf32> to vector<16xf32>
    %68 = vector.shape_cast %67 : vector<16xf32> to vector<16x1xf32>
    %cst_28 = arith.constant 2.500000e-02 : f32
    %69 = vector.broadcast %cst_28 : f32 to vector<16x1xf32>
    %70 = arith.mulf %68, %69 : vector<16x1xf32>
    %71 = vector.broadcast %70 : vector<16x1xf32> to vector<16x128xf32>
    %72 = arith.subf %66, %71 : vector<16x128xf32>
    %73 = vector.broadcast %6 : vector<1x128xf32> to vector<16x128xf32>
    %74 = arith.mulf %72, %73 : vector<16x128xf32>
    %75 = arith.mulf %74, %74 : vector<16x128xf32>
    %cst_29 = arith.constant dense<0.000000e+00> : vector<16xf32>
    %76 = vector.multi_reduction <add>, %75, %cst_29 [1] : vector<16x128xf32> to vector<16xf32>
    %77 = vector.shape_cast %76 : vector<16xf32> to vector<16x1xf32>
    %cst_30 = arith.constant 2.500000e-02 : f32
    %78 = vector.broadcast %cst_30 : f32 to vector<16x1xf32>
    %79 = arith.mulf %77, %78 : vector<16x1xf32>
    %cst_31 = arith.constant 9.99999974E-6 : f32
    %80 = vector.broadcast %cst_31 : f32 to vector<16x1xf32>
    %81 = arith.addf %79, %80 : vector<16x1xf32>
    %82 = math.rsqrt %81 : vector<16x1xf32>
    %83 = vector.broadcast %82 : vector<16x1xf32> to vector<16x128xf32>
    %84 = arith.mulf %74, %83 : vector<16x128xf32>
    %85 = vector.broadcast %4 : vector<1x128xf32> to vector<16x128xf32>
    %86 = arith.mulf %84, %85 : vector<16x128xf32>
    %87 = vector.broadcast %5 : vector<1x128xf32> to vector<16x128xf32>
    %88 = arith.addf %86, %87 : vector<16x128xf32>
    %89 = arith.truncf %88 : vector<16x128xf32> to vector<16x128xbf16>
    %c0_32 = arith.constant 0 : index
    %c0_33 = arith.constant 0 : index
    %90 = vector.load %arg5[%c0_32, %c0_33] : memref<16x128xbf16, #tpu.memory_space<vmem>>, vector<16x128xbf16>
    tpu.vector_store %arg5[%c0_32, %c0_33], %89 {strides = array<i32>} : memref<16x128xbf16, #tpu.memory_space<vmem>>, vector<16x128xbf16>,
    return
  }
  func.func @transform_0(%arg0: i32) -> (i32, i32) {
    %c0_i32 = arith.constant 0 : i32
    %c0_i32_0 = arith.constant 0 : i32
    return %arg0, %c0_i32 : i32, i32
  }
  func.func @transform_1(%arg0: i32) -> (i32, i32) {
    %c0_i32 = arith.constant 0 : i32
    %c0_i32_0 = arith.constant 0 : i32
    %c0_i32_1 = arith.constant 0 : i32
    return %c0_i32, %c0_i32_0 : i32, i32
  }
  func.func @transform_2(%arg0: i32) -> (i32, i32) {
    %c0_i32 = arith.constant 0 : i32
    %c0_i32_0 = arith.constant 0 : i32
    %c0_i32_1 = arith.constant 0 : i32
    return %c0_i32, %c0_i32_0 : i32, i32
  }
  func.func @transform_3(%arg0: i32) -> (i32, i32) {
    %c0_i32 = arith.constant 0 : i32
    %c0_i32_0 = arith.constant 0 : i32
    %c0_i32_1 = arith.constant 0 : i32
    return %c0_i32, %c0_i32_0 : i32, i32
  }
  func.func @transform_4(%arg0: i32) -> (i32, i32) {
    %c0_i32 = arith.constant 0 : i32
    %c0_i32_0 = arith.constant 0 : i32
    return %arg0, %c0_i32 : i32, i32
  }
}

module attributes {stable_mosaic.version = 11 : i64} {
  func.func @kernel(%arg0: i32, %arg1: memref<16x128xbf16, #tpu.memory_space<vmem>>, %arg2: memref<8x128xf32, #tpu.memory_space<vmem>>, %arg3: memref<128x128xbf16, #tpu.memory_space<vmem>>, %arg4: memref<128x128xbf16, #tpu.memory_space<vmem>>, %arg5: memref<16x128xbf16, #tpu.memory_space<vmem>>) attributes {dimension_semantics = [#tpu.dimension_semantics<parallel>], iteration_bounds = array<i64: 2>, scalar_prefetch = 0 : i64, scratch_operands = 0 : i64, tpu.core_type = #tpu.core_type<tc>, window_params = [{transform_indices = @transform_0, window_bounds = array<i64: 16, 128>}, {pipeline_mode = #tpu.pipeline_mode<synchronous>, transform_indices = @transform_1, window_bounds = array<i64: 8, 128>}, {pipeline_mode = #tpu.pipeline_mode<synchronous>, transform_indices = @transform_2, window_bounds = array<i64: 128, 128>}, {pipeline_mode = #tpu.pipeline_mode<synchronous>, transform_indices = @transform_3, window_bounds = array<i64: 128, 128>}, {transform_indices = @transform_4, window_bounds = array<i64: 16, 128>}]} {
    %c0 = arith.constant 0 : index
    %c0_0 = arith.constant 0 : index
    %0 = vector.load %arg2[%c0, %c0_0] : memref<8x128xf32, #tpu.memory_space<vmem>>, vector<1x128xf32>
    %c1 = arith.constant 1 : index
    %c0_1 = arith.constant 0 : index
    %1 = vector.load %arg2[%c1, %c0_1] : memref<8x128xf32, #tpu.memory_space<vmem>>, vector<1x128xf32>
    %c2 = arith.constant 2 : index
    %c0_2 = arith.constant 0 : index
    %2 = vector.load %arg2[%c2, %c0_2] : memref<8x128xf32, #tpu.memory_space<vmem>>, vector<1x128xf32>
    %c3 = arith.constant 3 : index
    %c0_3 = arith.constant 0 : index
    %3 = vector.load %arg2[%c3, %c0_3] : memref<8x128xf32, #tpu.memory_space<vmem>>, vector<1x128xf32>
    %c4 = arith.constant 4 : index
    %c0_4 = arith.constant 0 : index
    %4 = vector.load %arg2[%c4, %c0_4] : memref<8x128xf32, #tpu.memory_space<vmem>>, vector<1x128xf32>
    %c5 = arith.constant 5 : index
    %c0_5 = arith.constant 0 : index
    %5 = vector.load %arg2[%c5, %c0_5] : memref<8x128xf32, #tpu.memory_space<vmem>>, vector<1x128xf32>
    %c6 = arith.constant 6 : index
    %c0_6 = arith.constant 0 : index
    %6 = vector.load %arg2[%c6, %c0_6] : memref<8x128xf32, #tpu.memory_space<vmem>>, vector<1x128xf32>
    %c0_7 = arith.constant 0 : index
    %c0_8 = arith.constant 0 : index
    %7 = vector.load %arg1[%c0_7, %c0_8] : memref<16x128xbf16, #tpu.memory_space<vmem>>, vector<16x128xbf16>
    %8 = arith.extf %7 : vector<16x128xbf16> to vector<16x128xf32>
    %cst = arith.constant dense<0.000000e+00> : vector<16xf32>
    %9 = vector.multi_reduction <add>, %8, %cst [1] : vector<16x128xf32> to vector<16xf32>
    %10 = vector.shape_cast %9 : vector<16xf32> to vector<16x1xf32>
    %cst_9 = arith.constant 2.500000e-02 : f32
    %11 = vector.broadcast %cst_9 : f32 to vector<16x1xf32>
    %12 = arith.mulf %10, %11 : vector<16x1xf32>
    %13 = vector.broadcast %12 : vector<16x1xf32> to vector<16x128xf32>
    %14 = arith.subf %8, %13 : vector<16x128xf32>
    %15 = vector.broadcast %6 : vector<1x128xf32> to vector<16x128xf32>
    %16 = arith.mulf %14, %15 : vector<16x128xf32>
    %17 = arith.mulf %16, %16 : vector<16x128xf32>
    %cst_10 = arith.constant dense<0.000000e+00> : vector<16xf32>
    %18 = vector.multi_reduction <add>, %17, %cst_10 [1] : vector<16x128xf32> to vector<16xf32>
    %19 = vector.shape_cast %18 : vector<16xf32> to vector<16x1xf32>
    %cst_11 = arith.constant 2.500000e-02 : f32
    %20 = vector.broadcast %cst_11 : f32 to vector<16x1xf32>
    %21 = arith.mulf %19, %20 : vector<16x1xf32>
    %cst_12 = arith.constant 9.99999974E-6 : f32
    %22 = vector.broadcast %cst_12 : f32 to vector<16x1xf32>
    %23 = arith.addf %21, %22 : vector<16x1xf32>
    %24 = math.rsqrt %23 : vector<16x1xf32>
    %25 = vector.broadcast %24 : vector<16x1xf32> to vector<16x128xf32>
    %26 = arith.mulf %16, %25 : vector<16x128xf32>
    %27 = vector.broadcast %0 : vector<1x128xf32> to vector<16x128xf32>
    %28 = arith.mulf %26, %27 : vector<16x128xf32>
    %29 = vector.broadcast %1 : vector<1x128xf32> to vector<16x128xf32>
    %30 = arith.addf %28, %29 : vector<16x128xf32>
    %31 = arith.truncf %30 : vector<16x128xf32> to vector<16x128xbf16>
    %c0_13 = arith.constant 0 : index
    %c0_14 = arith.constant 0 : index
    %32 = vector.load %arg3[%c0_13, %c0_14] : memref<128x128xbf16, #tpu.memory_space<vmem>>, vector<128x128xbf16>
    %cst_15 = arith.constant dense<0.000000e+00> : vector<16x128xf32>
    %33 = tpu.matmul %31, %32, %cst_15 {dimension_numbers = #tpu.dot_dimension_numbers<[1], [0], [0], [1], [0, 0, 1, 1], [], []>} : vector<16x128xbf16>, vector<128x128xbf16>, vector<16x128xf32> -> vector<16x128xf32>
    %34 = vector.broadcast %2 : vector<1x128xf32> to vector<16x128xf32>
    %35 = arith.addf %33, %34 : vector<16x128xf32>
    %cst_16 = arith.constant 5.000000e-01 : f32
    %36 = vector.broadcast %cst_16 : f32 to vector<16x128xf32>
    %37 = arith.mulf %36, %35 : vector<16x128xf32>
    %cst_17 = arith.constant 4.471500e-02 : f32
    %38 = vector.broadcast %cst_17 : f32 to vector<16x128xf32>
    %39 = arith.mulf %38, %35 : vector<16x128xf32>
    %40 = arith.mulf %39, %35 : vector<16x128xf32>
    %41 = arith.mulf %40, %35 : vector<16x128xf32>
    %42 = arith.addf %35, %41 : vector<16x128xf32>
    %cst_18 = arith.constant 0.797884583 : f32
    %43 = vector.broadcast %cst_18 : f32 to vector<16x128xf32>
    %44 = arith.mulf %43, %42 : vector<16x128xf32>
    %45 = math.tanh %44 : vector<16x128xf32>
    %cst_19 = arith.constant 1.000000e+00 : f32
    %46 = vector.broadcast %cst_19 : f32 to vector<16x128xf32>
    %47 = arith.addf %46, %45 : vector<16x128xf32>
    %48 = arith.mulf %37, %47 : vector<16x128xf32>
    %49 = arith.truncf %48 : vector<16x128xf32> to vector<16x128xbf16>
    %c0_20 = arith.constant 0 : index
    %c0_21 = arith.constant 0 : index
    %50 = vector.load %arg4[%c0_20, %c0_21] : memref<128x128xbf16, #tpu.memory_space<vmem>>, vector<128x128xbf16>
    %cst_22 = arith.constant dense<0.000000e+00> : vector<16x128xf32>
    %51 = tpu.matmul %49, %50, %cst_22 {dimension_numbers = #tpu.dot_dimension_numbers<[1], [0], [0], [1], [0, 0, 1, 1], [], []>} : vector<16x128xbf16>, vector<128x128xbf16>, vector<16x128xf32> -> vector<16x128xf32>
    %52 = vector.broadcast %3 : vector<1x128xf32> to vector<16x128xf32>
    %53 = arith.addf %51, %52 : vector<16x128xf32>
    %cst_23 = arith.constant 5.000000e-01 : f32
    %54 = vector.broadcast %cst_23 : f32 to vector<16x128xf32>
    %55 = arith.mulf %54, %53 : vector<16x128xf32>
    %cst_24 = arith.constant 4.471500e-02 : f32
    %56 = vector.broadcast %cst_24 : f32 to vector<16x128xf32>
    %57 = arith.mulf %56, %53 : vector<16x128xf32>
    %58 = arith.mulf %57, %53 : vector<16x128xf32>
    %59 = arith.mulf %58, %53 : vector<16x128xf32>
    %60 = arith.addf %53, %59 : vector<16x128xf32>
    %cst_25 = arith.constant 0.797884583 : f32
    %61 = vector.broadcast %cst_25 : f32 to vector<16x128xf32>
    %62 = arith.mulf %61, %60 : vector<16x128xf32>
    %63 = math.tanh %62 : vector<16x128xf32>
    %cst_26 = arith.constant 1.000000e+00 : f32
    %64 = vector.broadcast %cst_26 : f32 to vector<16x128xf32>
    %65 = arith.addf %64, %63 : vector<16x128xf32>
    %66 = arith.mulf %55, %65 : vector<16x128xf32>
    %cst_27 = arith.constant dense<0.000000e+00> : vector<16xf32>
    %67 = vector.multi_reduction <add>, %66, %cst_27 [1] : vector<16x128xf32> to vector<16xf32>
    %68 = vector.shape_cast %67 : vector<16xf32> to vector<16x1xf32>
    %cst_28 = arith.constant 2.500000e-02 : f32
    %69 = vector.broadcast %cst_28 : f32 to vector<16x1xf32>
    %70 = arith.mulf %68, %69 : vector<16x1xf32>
    %71 = vector.broadcast %70 : vector<16x1xf32> to vector<16x128xf32>
    %72 = arith.subf %66, %71 : vector<16x128xf32>
    %73 = vector.broadcast %6 : vector<1x128xf32> to vector<16x128xf32>
    %74 = arith.mulf %72, %73 : vector<16x128xf32>
    %75 = arith.mulf %74, %74 : vector<16x128xf32>
    %cst_29 = arith.constant dense<0.000000e+00> : vector<16xf32>
    %76 = vector.multi_reduction <add>, %75, %cst_29 [1] : vector<16x128xf32> to vector<16xf32>
    %77 = vector.shape_cast %76 : vector<16xf32> to vector<16x1xf32>
    %cst_30 = arith.constant 2.500000e-02 : f32
    %78 = vector.broadcast %cst_30 : f32 to vector<16x1xf32>
    %79 = arith.mulf %77, %78 : vector<16x1xf32>
    %cst_31 = arith.constant 9.99999974E-6 : f32
    %80 = vector.broadcast %cst_31 : f32 to vector<16x1xf32>
    %81 = arith.addf %79, %80 : vector<16x1xf32>
    %82 = math.rsqrt %81 : vector<16x1xf32>
    %83 = vector.broadcast %82 : vector<16x1xf32> to vector<16x128xf32>
    %84 = arith.mulf %74, %83 : vector<16x128xf32>
    %85 = vector.broadcast %4 : vector<1x128xf32> to vector<16x128xf32>
    %86 = arith.mulf %84, %85 : vector<16x128xf32>
    %87 = vector.broadcast %5 : vector<1x128xf32> to vector<16x128xf32>
    %88 = arith.addf %86, %87 : vector<16x128xf32>
    %89 = arith.truncf %88 : vector<16x128xf32> to vector<16x128xbf16>
    %c0_32 = arith.constant 0 : index
    %c0_33 = arith.constant 0 : index
    %90 = vector.load %arg5[%c0_32, %c0_33] : memref<16x128xbf16, #tpu.memory_space<vmem>>, vector<16x128xbf16>
    tpu.vector_store %arg5[%c0_32, %c0_33], %89 {strides = array<i32>} : memref<16x128xbf16, #tpu.memory_space<vmem>>, vector<16x128xbf16>,
    return
  }
  func.func @transform_0(%arg0: i32) -> (i32, i32) {
    %c0_i32 = arith.constant 0 : i32
    %c0_i32_0 = arith.constant 0 : i32
    return %arg0, %c0_i32 : i32, i32
  }
  func.func @transform_1(%arg0: i32) -> (i32, i32) {
    %c0_i32 = arith.constant 0 : i32
    %c0_i32_0 = arith.constant 0 : i32
    %c0_i32_1 = arith.constant 0 : i32
    return %c0_i32, %c0_i32_0 : i32, i32
  }
  func.func @transform_2(%arg0: i32) -> (i32, i32) {
    %c0_i32 = arith.constant 0 : i32
    %c0_i32_0 = arith.constant 0 : i32
    %c0_i32_1 = arith.constant 0 : i32
    return %c0_i32, %c0_i32_0 : i32, i32
  }
  func.func @transform_3(%arg0: i32) -> (i32, i32) {
    %c0_i32 = arith.constant 0 : i32
    %c0_i32_0 = arith.constant 0 : i32
    %c0_i32_1 = arith.constant 0 : i32
    return %c0_i32, %c0_i32_0 : i32, i32
  }
  func.func @transform_4(%arg0: i32) -> (i32, i32) {
    %c0_i32 = arith.constant 0 : i32
    %c0_i32_0 = arith.constant 0 : i32
    return %arg0, %c0_i32 : i32, i32
  }
}

</mosaic_0001>

<bundles_post_ra>
// kernel: tpu_custom_call.1
= control target key start
LH: loop header
LB: loop body
LE: loop exit
PB: predicated region body
PF: predicated region fallthrough
CT: control target
= control target key end

     0   :  { %s1505_s0 = inlined_call_operand.hbm [shape: bf16[18,128], index: 0, kind: input, shape index: {}]   ;;  %s1506_s1 = inlined_call_operand.hbm [shape: f32[8,128], index: 1, kind: input, shape index: {}]   ;;  %s1507_s2 = inlined_call_operand.hbm [shape: bf16[128,128], index: 2, kind: input, shape index: {}]   ;;  %s1508_s3 = inlined_call_operand.hbm [shape: bf16[128,128], index: 3, kind: input, shape index: {}]   ;;  %s1509_s4 = inlined_call_operand.hbm [shape: bf16[18,128], index: 4, kind: output, shape index: {}]  }
   0x1   :  { %1513 = sst [smem:[#allocation16_spill]] %s1506_s1 }
   0x2   :  { %9 = vsyncpa [#allocation3], 0 }
   0x3   :  { %11 = vsyncpa [#allocation3 + $0x1], 0 }
   0x4   :  { %12 = vsyncpa [#allocation6], 0 }
   0x5   :  { %13 = vsyncpa [#allocation9], 0 }
   0x6   :  { %14 = vsyncpa [#allocation4], 0 }
   0x7   :  { %16 = vsyncpa [#allocation4 + $0x1], 0  ;;  %s1210_s15 = smov 0   ;;  %s1212_s16 = smov 0  }
   0x8   :  { %s1214_s17 = smov 0   ;;  %s1216_s18 = smov 0  }
   0x9 LB: > { %s1231_s19 = sadd.s32 4294967295, %s1170_s18   ;;  %s750_s20 = sadd.s32 4294967294, %s1170_s18   ;;  %s1170_s18 = sphi %s1216_s18, %s1536_s18   ;;  %s1166_s17 = sphi %s1214_s17, %s1535_s17   ;;  %s1162_s16 = sphi %s1212_s16, %s1534_s16   ;;  %s1158_s15 = sphi %s1210_s15, %s1533_s15  }
   0xa   : > { %s1235_s21 = sadd.s32 1, %s1170_s18   ;;  %s29_s22 = sadd.s32 1, %s1166_s17 }
   0xb   : > { %s26_s23 = ssub.s32 %s1170_s18, %s1235_s21  ;;  %p36_p0 = scmp.ne.s32.totalorder %s1166_s17, %s1162_s16 }
   0xc   : > { %p27_p1 = scmp.eq.s32.totalorder %s26_s23, 0  ;;  %p37_p2 = scmp.eq.s32.totalorder %s1170_s18, 0 }
   0xd   : > { %p42_p3 = scmp.ne.s32.totalorder %s1162_s16, %s1158_s15  ;;  %p1510_p4 = scmp.eq.s32.totalorder %s1231_s19, 0 }
   0xe   : > { %s1247_s24 = scalar_select %p27_p1, %s1166_s17, %s29_s22  }
   0xf   : > { %p1249_p5 = por %p37_p2, %p36_p0  ;;  %p1255_p6 = por %p1510_p4, %p42_p3 }
  0x10   : > { %1514 = sst [smem:[#allocation15_spill]] %s1247_s24  ;;  %p129_p7 = scmp.eq.s32.totalorder %s1231_s19, 1 }
  0x11   : > { %s1515_s25 = scalar_select %p1249_p5, 1, 0 }
  0x12   : > { %s1516_s26 = scalar_select %p1255_p6, 1, 0 }
  0x13   : > { %p135_p8 = scmp.eq.s32.totalorder %s750_s20, 1  ;;  %p751_p9 = scmp.ge.s32.totalorder %s1170_s18, 1 }
  0x14   : > { %p142_p10 = scmp.lt.s32.totalorder %s1170_s18, 3  ;;  %p1262_p11 = por %p129_p7, %p36_p0 }
  0x15   : > { %p1266_p12 = por %p135_p8, %p42_p3  ;;  %s1172_s30 = smov [#allocation5]  }
  0x16   : > { %s1517_s27 = scalar_select %p1262_p11, 1, 0 }
  0x17   : > { %s1518_s28 = scalar_select %p1266_p12, 1, 0 }
  0x18   : > { %p1270_p13 = pnand %p751_p9, %p142_p10  ;;  %s155_s5 = sshll.u32 %s1172_s30, 4  ;;  %s156_s5 = int_to_ptr.vmem [resolvable:$true] %s155_s5 }
  0x19   : > { %s1173_s6 = smov [#allocation7]   ;;  %s1521_s1 = sld [smem:[#allocation16_spill]] }
  0x1a   : > { %s1519_s29 = scalar_select %p1270_p13, 1, 0 }
  0x1b   : > { %p888_p1 = pneg %p1270_p13  ;;  %s165_s7 = sshll.u32 %s1173_s6, 4  ;;  %s1282_s7 = int_to_ptr.vmem [resolvable:$true] %s165_s7 }
  0x1d   : > { %p1278_p0 = pnand %p888_p1, %p1510_p4 }
  0x1f   : > { %s984_s11 = scalar_lea.hbm %s1521_s1, 128  ;;  %p1292_p3 = pneg %p1278_p0 }
  0x20   : > { %p985_p2 = scmp.ne.s32.totalorder %s1521_s1, %s984_s11  ;;  %p991_p9 = scmp.lt.u32.totalorder %s984_s11, %s1521_s1 }
  0x22   : > { %p987_p7 = pnand %p1292_p3, %p985_p2 }
  0x24   : > { %p988_p8 = pneg %p987_p7 }
  0x26   : > { %p993_p10 = pnand %p991_p9, %p988_p8 }
  0x28   : > { %996 = shalt.err (!%p993_p10)
}
  0x29   : > { %s997_s23 = scalar_lea.vmem %s156_s5, 128  ;;  %p1005_p11 = scmp.lt.s32.totalorder %s156_s5, %s156_s5 }
  0x2a   : > { %p998_p1 = scmp.ne.s32.totalorder %s156_s5, %s997_s23  ;;  %p1006_p6 = scmp.lt.s32.totalorder %s997_s23, %s997_s23 }
  0x2c   : > { %p1000_p4 = pnand %p998_p1, %p1292_p3  ;;  %p1007_p13 = por %p1006_p6, %p1005_p11 }
  0x2e   : > { %p1001_p12 = pneg %p1000_p4 }
  0x30   : > { %p1008_p5 = pnand %p1007_p13, %p1001_p12 }
  0x32   : > { %1011 = shalt.err (!%p1008_p5)
}
  0x33   : > { %891 = dma.hbm_to_vmem [thread:$0]  (!%p1278_p0), %s1521_s1, 128, %s156_s5, [#allocation6]  }
  0x34   : > { %s1012_s11 = scalar_lea.hbm %s1507_s2, 1024 }
  0x35   : > { %p1013_p4 = scmp.ne.s32.totalorder %s1507_s2, %s1012_s11  ;;  %p1019_p5 = scmp.lt.u32.totalorder %s1012_s11, %s1507_s2 }
  0x37   : > { %p1015_p2 = pnand %p1013_p4, %p1292_p3 }
  0x39   : > { %p1016_p6 = pneg %p1015_p2 }
  0x3b   : > { %p1021_p11 = pnand %p1019_p5, %p1016_p6 }
  0x3d   : > { %1024 = shalt.err (!%p1021_p11)
}
  0x3e   : > { %s1025_s5 = scalar_lea.vmem %s1282_s7, 1024  ;;  %p1033_p8 = scmp.lt.s32.totalorder %s1282_s7, %s1282_s7 }
  0x3f   : > { %p1026_p12 = scmp.ne.s32.totalorder %s1282_s7, %s1025_s5  ;;  %p1034_p9 = scmp.lt.s32.totalorder %s1025_s5, %s1025_s5 }
  0x41   : > { %p1028_p13 = pnand %p1026_p12, %p1292_p3  ;;  %p1035_p10 = por %p1034_p9, %p1033_p8 }
  0x43   : > { %p1029_p7 = pneg %p1028_p13 }
  0x45   : > { %p1036_p1 = pnand %p1035_p10, %p1029_p7 }
  0x47   : > { %1039 = shalt.err (!%p1036_p1)
}
  0x48   : > { %s1174_s23 = smov 64   ;;  %s1175_s30 = smov 4  }
  0x49   : > { %894 = dma.hbm_to_vmem [thread:$0]  (!%p1278_p0), %s1507_s2, 1024, %s1282_s7, [#allocation6], %s1174_s23, %s1174_s23, %s1175_s30  }
  0x4a   : > { %s1176_s10 = smov [#allocation8]   ;;  %s1040_s20 = scalar_lea.hbm %s1508_s3, 1024 }
  0x4b   : > { %s178_s11 = sshll.u32 %s1176_s10, 4  ;;  %p1041_p4 = scmp.ne.s32.totalorder %s1508_s3, %s1040_s20  ;;  %s179_s11 = int_to_ptr.vmem [resolvable:$true] %s178_s11 }
  0x4c   : > { %p1047_p5 = scmp.lt.u32.totalorder %s1040_s20, %s1508_s3 }
  0x4d   : > { %p1043_p2 = pnand %p1041_p4, %p1292_p3 }
  0x4f   : > { %p1044_p6 = pneg %p1043_p2 }
  0x51   : > { %p1049_p11 = pnand %p1047_p5, %p1044_p6 }
  0x53   : > { %1052 = shalt.err (!%p1049_p11)
}
  0x54   : > { %s1053_s7 = scalar_lea.vmem %s179_s11, 1024  ;;  %p1061_p8 = scmp.lt.s32.totalorder %s179_s11, %s179_s11 }
  0x55   : > { %p1054_p12 = scmp.ne.s32.totalorder %s179_s11, %s1053_s7  ;;  %p1062_p9 = scmp.lt.s32.totalorder %s1053_s7, %s1053_s7 }
  0x57   : > { %p1056_p13 = pnand %p1054_p12, %p1292_p3  ;;  %p1063_p10 = por %p1062_p9, %p1061_p8 }
  0x59   : > { %p1057_p7 = pneg %p1056_p13 }
  0x5b   : > { %p1064_p1 = pnand %p1063_p10, %p1057_p7 }
  0x5d   : > { %1067 = shalt.err (!%p1064_p1)
}
  0x5e   : > { %897 = dma.hbm_to_vmem [thread:$0]  (!%p1278_p0), %s1508_s3, 1024, %s179_s11, [#allocation9], %s1174_s23, %s1174_s23, %s1175_s30  }
  0x5f   : > { %p755_p4 = scmp.ge.s32.totalorder %s1170_s18, 2 }
  0x60   : > { %p1523_p2 = scmp.ne.s32.totalorder (!%p755_p4), %s1515_s25, 0 }
  0x61   : > { %188 = sbr.rel (%p755_p4) target bundleno = 139 (0x8b), region = 28 }
  0x68   : > { %191 = sbr.rel (!%p1523_p2) target bundleno = 139 (0x8b), region = 32  ;;  %s192_s1 = sand.u32 (%p1523_p2), 1, %s1166_s17  }
  0x69   : > { %s757_s24 = sshll.u32 (%p1523_p2), %s1170_s18, 1  ;;  %s756_s14 = sshll.u32 (%p1523_p2), %s192_s1, 3 }
  0x6a   : > { %s198_s10 = ssub.s32 (%p1523_p2), 3, %s757_s24  ;;  %s1359_s30 = scalar_lea.sflag (%p1523_p2), [#allocation3], %s192_s1 }
  0x6b   : > { %p199_p3 = scmp.lt.s32.totalorder (%p1523_p2), %s198_s10, 2  ;;  %s196_s11 = scalar_lea.vmem (%p1523_p2), [#allocation2], %s756_s14 }
  0x6f   : > { %s1538_s10 = smov (!%p199_p3, %s198_s10), 2 }
  0x70   : > { %s1356_s8 = sshll.u32 %s1538_s10, 6 }
  0x71   : > { %s203_s23 = ssub.s32 128, %s1356_s8 }
  0x72   : > { %204 = vsyncadd %s1359_s30, %s203_s23  ;;  %p759_p0 = scmp.ne.s32.totalorder %s1356_s8, 0  ;;  %s803_s25 = sshll.u32 %s1170_s18, 7 }
  0x73   : > { %s1367_s20 = scalar_lea.hbm %s1505_s0, %s803_s25  ;;  %s209_s22 = sshll.u32 %s196_s11, 4  ;;  %s1369_s22 = int_to_ptr.vmem [resolvable:$true] %s209_s22 }
  0x74   : > { %s1068_s5 = scalar_lea.hbm %s1367_s20, %s1356_s8  ;;  %s1072_s9 = scalar_lea.hbm %s1505_s0, 192 }
  0x75   : > { %p1069_p6 = scmp.ne.s32.totalorder %s1367_s20, %s1068_s5  ;;  %p1073_p12 = scmp.lt.u32.totalorder %s1367_s20, %s1505_s0 }
  0x76   : > { %p1074_p13 = scmp.lt.u32.totalorder %s1072_s9, %s1068_s5  ;;  %p1076_p8 = scmp.lt.u32.totalorder %s1068_s5, %s1367_s20 }
  0x77   : > { %p1070_p5 = pnand %p1069_p6, %p759_p0 }
  0x78   : > { %p1075_p7 = por %p1074_p13, %p1073_p12 }
  0x79   : > { %p1071_p11 = pneg %p1070_p5 }
  0x7a   : > { %p1077_p9 = por %p1076_p8, %p1075_p7 }
  0x7c   : > { %p1078_p10 = pnand %p1077_p9, %p1071_p11 }
  0x7e   : > { %1081 = shalt.err (!%p1078_p10)
}
  0x7f   : > { %s1082_s14 = scalar_lea.vmem %s1369_s22, %s1356_s8  ;;  %s1177_s10 = smov [#allocation2]  }
  0x80   : > { %p1083_p1 = scmp.ne.s32.totalorder %s1369_s22, %s1082_s14  ;;  %s1086_s23 = sshll.u32 %s1177_s10, 4  ;;  %s1087_s23 = int_to_ptr.vmem [resolvable:$false] %s1086_s23 }
  0x81   : > { %s1088_s11 = scalar_lea.vmem %s1087_s23, 256  ;;  %p1089_p6 = scmp.lt.s32.totalorder %s1369_s22, %s1087_s23 }
  0x82   : > { %p1084_p2 = pnand %p1083_p1, %p759_p0  ;;  %p1090_p5 = scmp.lt.s32.totalorder %s1088_s11, %s1082_s14 }
  0x84   : > { %p1085_p3 = pneg %p1084_p2  ;;  %p1091_p12 = por %p1090_p5, %p1089_p6 }
  0x86   : > { %p1092_p13 = pnand %p1091_p12, %p1085_p3 }
  0x88   : > { %1095 = shalt.err (!%p1092_p13)
}
  0x89   : > { %s1178_s25 = smov 64   ;;  %s1179_s12 = smov 4  }
  0x8a   : > { %215 = dma.hbm_to_vmem [thread:$0]  (%p759_p0), %s1367_s20, %s1356_s8, %s1369_s22, %s1359_s30, %s1178_s25, %s1178_s25, %s1179_s12  }
  0x8b PF: > { %p1524_p11 = scmp.ne.s32.totalorder %s1519_s29, 0 }
  0x8c   : > { %s1399_s13 = sand.u32 (!%p1524_p11), 1, %s1162_s16   ;;  %p1525_p7 = scmp.ne.s32.totalorder (!%p1524_p11), %s1516_s26, 0 }
  0x8d   : > { %221 = sbr.rel (%p1524_p11) target bundleno = 1305 (0x519), region = 36  ;;  %s764_s5 = sshll.u32 (!%p1524_p11), %s1399_s13, 3 }
  0x8e   : > { %s224_s7 = scalar_lea.sflag (!%p1524_p11), [#allocation3], %s1399_s13  ;;  %s227_s6 = scalar_lea.vmem (!%p1524_p11), [#allocation2], %s764_s5 }
  0x94   : > { %1141 = dma.done.wait (%p1525_p7), %s224_s7, 128  }
  0x95   : > { %1143 = vsyncadd (%p1525_p7), %s224_s7, 4294967168  ;;  %p1526_p0 = scmp.eq.s32.totalorder %s1231_s19, 0 }
  0x97   : > { %1145 = dma.done.wait (%p1526_p0), [#allocation6], 1152   ;;  %p1527_p8 = pmov %p1526_p0 }
  0x98   : > { %p1528_p9 = pmov %p1526_p0 }
  0x99   : > { %1147 = vsyncadd (%p1527_p8), [#allocation6], 4294966144 }
  0x9a   : > { %1149 = dma.done.wait (%p1528_p9), [#allocation9], 1024   ;;  %p1529_p10 = pmov %p1526_p0 }
  0x9b   : > { %v808_v0 = vld [vmem:[%s227_s6] sm:$0xff]   ;;  %v952_v3 = vld [vmem:[#allocation7] sm:$0xff]   ;;  %v1180_v4 = vmov 0.0   ;;  %v1420_v7 = vld [vmem:[#allocation5 + $0x6] ss:$0 sm:$0xff]  ;;  %vm1181_vm0 = vmmov 0  }
  0x9c   : > { %1151 = vsyncadd (%p1529_p10), [#allocation9], 4294966272  ;;  %v809_v1 = vunpack.c.l.bf16 %v808_v0  ;;  %v810_v2 = vunpack.c.h.bf16 %v808_v0  ;;  %834 = vmatprep.subr.bf16.mxu0 %v1180_v4  ;;  %854 = vmatprep.subr.bf16.mxu1 %v1180_v4  ;;  %v953_v16 = vld [vmem:[#allocation7 + $0x8] sm:$0xff]   ;;  %v954_v17 = vld [vmem:[#allocation7 + $0x10] sm:$0xff]   ;;  %s263_s26 = scalar_lea.vmem [#allocation10], %s764_s5  ;;  %s629_s29 = scalar_lea.sflag [#allocation4], %s1399_s13 }
  0x9d   : > { %835 = vmatpush3.bf16.msra.mxu0 %v952_v3  ;;  %v955_v18 = vld [vmem:[#allocation7 + $0x18] sm:$0xff]   ;;  %v956_v19 = vld [vmem:[#allocation7 + $0x20] sm:$0xff]   ;;  %850 = vmatprep.mubr.msk.bf16.mxu0 %vm1181_vm0, %v1180_v4  ;;  %v957_v20 = vld [vmem:[#allocation7 + $0x28] sm:$0xff]   ;;  %p1530_p1 = scmp.ne.s32.totalorder %s1517_s27, 0 }
  0x9e   : > { %286 = vadd.xlane.f32.xlu0 %v809_v1  ;;  %836 = vmatprep.subr.bf16.mxu0 %v1180_v4  ;;  %v958_v21 = vld [vmem:[#allocation7 + $0x30] sm:$0xff]   ;;  %v959_v22 = vld [vmem:[#allocation7 + $0x38] sm:$0xff]   ;;  %v960_v40 = vld [vmem:[#allocation8] sm:$0xff]   ;;  %s795_s8 = sshll.u32 (%p1530_p1), %s1231_s19, 1 }
  0x9f   : > { %870 = vmatprep.mubr.msk.bf16.mxu1 %vm1181_vm0, %v1180_v4  ;;  %v770_v31 = vld [vmem:[#allocation5] ss:$0 sm:$0xff]  ;;  %v771_v35 = vld [vmem:[#allocation5 + $0x1] ss:$0 sm:$0xff]  ;;  %855 = vmatpush3.bf16.msra.mxu1 %v960_v40  ;;  %v961_v41 = vld [vmem:[#allocation8 + $0x8] sm:$0xff]   ;;  %s637_s30 = ssub.s32 (%p1530_p1), 3, %s795_s8 }
  0xa0   : > { %856 = vmatprep.subr.bf16.mxu1 %v1180_v4  ;;  %v962_v42 = vld [vmem:[#allocation8 + $0x10] sm:$0xff]   ;;  %v963_v43 = vld [vmem:[#allocation8 + $0x18] sm:$0xff]   ;;  %v964_v44 = vld [vmem:[#allocation8 + $0x20] sm:$0xff]   ;;  %p638_p2 = scmp.lt.s32.totalorder (%p1530_p1), %s637_s30, 2 }
  0xa1   : > { %837 = vmatpush3.bf16.msra.mxu0 %v953_v16  ;;  %v965_v45 = vld [vmem:[#allocation8 + $0x28] sm:$0xff]   ;;  %v966_v46 = vld [vmem:[#allocation8 + $0x30] sm:$0xff]   ;;  %v967_v47 = vld [vmem:[#allocation8 + $0x38] sm:$0xff]  }
  0xa2   : > { %288 = vadd.xlane.f32.xlu0 %v810_v2  ;;  %838 = vmatprep.subr.bf16.mxu0 %v1180_v4  ;;  %v772_v48 = vld [vmem:[#allocation5 + $0x2] ss:$0 sm:$0xff] }
  0xa3   : > { %857 = vmatpush3.bf16.msra.mxu1 %v961_v41 }
  0xa4   : > { %858 = vmatprep.subr.bf16.mxu1 %v1180_v4 }
  0xa5   : > { %839 = vmatpush3.bf16.msra.mxu0 %v954_v17 }
  0xa6   : > { %840 = vmatprep.subr.bf16.mxu0 %v1180_v4 }
  0xa7   : > { %859 = vmatpush3.bf16.msra.mxu1 %v962_v42 }
  0xa8   : > { %860 = vmatprep.subr.bf16.mxu1 %v1180_v4 }
  0xa9   : > { %841 = vmatpush3.bf16.msra.mxu0 %v955_v18 }
  0xaa   : > { %842 = vmatprep.subr.bf16.mxu0 %v1180_v4 }
  0xab   : > { %861 = vmatpush3.bf16.msra.mxu1 %v963_v43 }
  0xac   : > { %862 = vmatprep.subr.bf16.mxu1 %v1180_v4 }
  0xad   : > { %843 = vmatpush3.bf16.msra.mxu0 %v956_v19 }
  0xae   : > { %844 = vmatprep.subr.bf16.mxu0 %v1180_v4 }
  0xaf   : > { %863 = vmatpush3.bf16.msra.mxu1 %v964_v44 }
  0xb0   : > { %864 = vmatprep.subr.bf16.mxu1 %v1180_v4 }
  0xb1   : > { %845 = vmatpush3.bf16.msra.mxu0 %v957_v20 }
  0xb2   : > { %846 = vmatprep.subr.bf16.mxu0 %v1180_v4 }
  0xb3   : > { %865 = vmatpush3.bf16.msra.mxu1 %v965_v45 }
  0xb4   : > { %866 = vmatprep.subr.bf16.mxu1 %v1180_v4 }
  0xb5   : > { %847 = vmatpush3.bf16.msra.mxu0 %v958_v21 }
  0xb6   : > { %848 = vmatprep.subr.bf16.mxu0 %v1180_v4 }
  0xb7   : > { %867 = vmatpush3.bf16.msra.mxu1 %v966_v46 }
  0xb8   : > { %868 = vmatprep.subr.bf16.mxu1 %v1180_v4 }
  0xb9   : > { %849 = vmatpush3.bf16.msra.mxu0 %v959_v22 }
  0xbb   : > { %869 = vmatpush3.bf16.msra.mxu1 %v967_v47 }
 0x12b   : > { %v287_v5 = vpop.xlane.xlu0 %286 }
 0x12c   : > { %v290_v6 = vmul.f32 0.025, %v287_v5 }
 0x12e   : > { %v292_v8 = vsub.f32 %v809_v1, %v290_v6 }
 0x12f   : > { %v289_v9 = vpop.xlane.xlu0 %288 }
 0x130   : > { %v291_v10 = vmul.f32 0.025, %v289_v9  ;;  %v298_v11 = vmul.f32 %v1420_v7, %v292_v8 }
 0x132   : > { %v293_v12 = vsub.f32 %v810_v2, %v291_v10  ;;  %v300_v13 = vmul.f32 %v298_v11, %v298_v11 }
 0x134   : > { %302 = vadd.xlane.f32.xlu1 %v300_v13  ;;  %v299_v14 = vmul.f32 %v1420_v7, %v293_v12 }
 0x136   : > { %v301_v15 = vmul.f32 %v299_v14, %v299_v14 }
 0x138   : > { %304 = vadd.xlane.f32.xlu1 %v301_v15 }
 0x1c1   : > { %v303_v23 = vpop.xlane.xlu1 %302 }
 0x1c2   : > { %v306_v24 = vmul.f32 0.025, %v303_v23 }
 0x1c4   : > { %v308_v25 = vadd.f32 1e-05, %v306_v24 }
 0x1c5   : > { %v305_v26 = vpop.xlane.xlu1 %304 }
 0x1c6   : > { %968 = vrsqrt.f32 %v308_v25  ;;  %v307_v27 = vmul.f32 0.025, %v305_v26 }
 0x1c8   : > { %v309_v28 = vadd.f32 1e-05, %v307_v27 }
 0x1ca   : > { %970 = vrsqrt.f32 %v309_v28 }
 0x1d0   : > { %v969_v29 = vpop.eup %968 }
 0x1d1   : > { %v312_v30 = vmul.f32 %v969_v29, %v298_v11  ;;  %v781_v11 = vld [vmem:[#allocation5 + $0x3] ss:$0 sm:$0xff] }
 0x1d3   : > { %v318_v34 = vmul.f32 %v770_v31, %v312_v30 }
 0x1d4   : > { %v971_v32 = vpop.eup %970 }
 0x1d5   : > { %v313_v33 = vmul.f32 %v971_v32, %v299_v14  ;;  %v324_v37 = vadd.f32 %v771_v35, %v318_v34 }
 0x1d7   : > { %v319_v36 = vmul.f32 %v770_v31, %v313_v33 }
 0x1d9   : > { %v325_v38 = vadd.f32 %v771_v35, %v319_v36 }
 0x1db   : > { %v326_v39 = vpack.c.bf16 %v325_v38, %v324_v37 }
 0x1dd   : > { %851 = vmatmul.mubr.bf16.vlgmr.msra.gmra.mrb[0].mxu0 %v326_v39 }
 0x2b0   : > { %v429_v49 = vpop.f32.mrb[0].mxu0 }
 0x2b1   : > { %v430_v50 = vadd.f32 %v772_v48, %v429_v49  ;;  %v852_v51 = vpop.f32.mrb[1].mxu0 }
 0x2b2   : > { %v432_v52 = vpop.f32.mrb[2].mxu0 }
 0x2b3   : > { %v438_v53 = vmul.f32 0.044715, %v430_v50  ;;  %v433_v54 = vadd.f32 %v772_v48, %v432_v52  ;;  %v853_v55 = vpop.f32.mrb[3].mxu0  ;;  %v436_v4 = vmul.f32 0.5, %v430_v50 }
 0x2b5   : > { %v440_v56 = vmul.f32 %v438_v53, %v430_v50  ;;  %v439_v57 = vmul.f32 0.044715, %v433_v54  ;;  %v437_v5 = vmul.f32 0.5, %v433_v54  ;;  %v790_v53 = vld [vmem:[#allocation5 + $0x4] ss:$0 sm:$0xff] }
 0x2b7   : > { %v442_v58 = vmul.f32 %v440_v56, %v430_v50  ;;  %v441_v59 = vmul.f32 %v439_v57, %v433_v54 }
 0x2b9   : > { %v443_v60 = vmul.f32 %v441_v59, %v433_v54  ;;  %v444_v61 = vadd.f32 %v442_v58, %v430_v50 }
 0x2bb   : > { %v445_v62 = vadd.f32 %v443_v60, %v433_v54  ;;  %v446_v63 = vmul.f32 0.7978846, %v444_v61 }
 0x2bd   : > { %v447_v0 = vmul.f32 0.7978846, %v445_v62  ;;  %972 = vtanh.f32 %v446_v63 }
 0x2bf   : > { %974 = vtanh.f32 %v447_v0 }
 0x2c7   : > { %v973_v1 = vpop.eup %972 }
 0x2c8   : > { %v450_v2 = vadd.f32 1.0, %v973_v1 }
 0x2c9   : > { %v975_v3 = vpop.eup %974 }
 0x2ca   : > { %v451_v6 = vadd.f32 1.0, %v975_v3  ;;  %v452_v8 = vmul.f32 %v450_v2, %v436_v4 }
 0x2cc   : > { %v453_v9 = vmul.f32 %v451_v6, %v437_v5 }
 0x2ce   : > { %v454_v10 = vpack.c.bf16 %v453_v9, %v452_v8 }
 0x2d0   : > { %871 = vmatmul.mubr.bf16.vlgmr.msra.gmra.mrb[0].mxu1 %v454_v10 }
 0x3a3   : > { %v557_v12 = vpop.f32.mrb[0].mxu1 }
 0x3a4   : > { %v558_v13 = vadd.f32 %v781_v11, %v557_v12  ;;  %v872_v14 = vpop.f32.mrb[1].mxu1 }
 0x3a5   : > { %v560_v15 = vpop.f32.mrb[2].mxu1 }
 0x3a6   : > { %v566_v16 = vmul.f32 0.044715, %v558_v13  ;;  %v561_v17 = vadd.f32 %v781_v11, %v560_v15  ;;  %v873_v18 = vpop.f32.mrb[3].mxu1  ;;  %v564_v29 = vmul.f32 0.5, %v558_v13 }
 0x3a8   : > { %v567_v19 = vmul.f32 0.044715, %v561_v17  ;;  %v568_v20 = vmul.f32 %v566_v16, %v558_v13  ;;  %v565_v33 = vmul.f32 0.5, %v561_v17 }
 0x3aa   : > { %v570_v21 = vmul.f32 %v568_v20, %v558_v13  ;;  %v569_v22 = vmul.f32 %v567_v19, %v561_v17 }
 0x3ac   : > { %v572_v23 = vadd.f32 %v570_v21, %v558_v13  ;;  %v571_v24 = vmul.f32 %v569_v22, %v561_v17 }
 0x3ae   : > { %v574_v25 = vmul.f32 0.7978846, %v572_v23  ;;  %v573_v26 = vadd.f32 %v571_v24, %v561_v17 }
 0x3b0   : > { %976 = vtanh.f32 %v574_v25  ;;  %v575_v27 = vmul.f32 0.7978846, %v573_v26 }
 0x3b2   : > { %978 = vtanh.f32 %v575_v27 }
 0x3ba   : > { %v977_v28 = vpop.eup %976 }
 0x3bb   : > { %v578_v30 = vadd.f32 1.0, %v977_v28 }
 0x3bc   : > { %v979_v31 = vpop.eup %978 }
 0x3bd   : > { %v580_v32 = vmul.f32 %v578_v30, %v564_v29  ;;  %v579_v34 = vadd.f32 1.0, %v979_v31 }
 0x3bf   : > { %582 = vadd.xlane.f32.xlu0 %v580_v32  ;;  %v581_v35 = vmul.f32 %v579_v34, %v565_v33 }
 0x3c1   : > { %584 = vadd.xlane.f32.xlu1 %v581_v35 }
 0x44c   : > { %v583_v36 = vpop.xlane.xlu0 %582 }
 0x44d   : > { %v586_v37 = vmul.f32 0.025, %v583_v36 }
 0x44e   : > { %v585_v38 = vpop.xlane.xlu1 %584 }
 0x44f   : > { %v588_v39 = vsub.f32 %v580_v32, %v586_v37  ;;  %v587_v40 = vmul.f32 0.025, %v585_v38 }
 0x451   : > { %v589_v41 = vsub.f32 %v581_v35, %v587_v40  ;;  %v590_v42 = vmul.f32 %v1420_v7, %v588_v39 }
 0x453   : > { %v592_v43 = vmul.f32 %v590_v42, %v590_v42  ;;  %v591_v44 = vmul.f32 %v1420_v7, %v589_v41  ;;  %v791_v7 = vld [vmem:[#allocation5 + $0x5] ss:$0 sm:$0xff] }
 0x455   : > { %594 = vadd.xlane.f32.xlu0 %v592_v43  ;;  %v593_v45 = vmul.f32 %v591_v44, %v591_v44 }
 0x457   : > { %596 = vadd.xlane.f32.xlu1 %v593_v45 }
 0x4e2   : > { %v595_v46 = vpop.xlane.xlu0 %594 }
 0x4e3   : > { %v598_v47 = vmul.f32 0.025, %v595_v46 }
 0x4e4   : > { %v597_v48 = vpop.xlane.xlu1 %596 }
 0x4e5   : > { %v600_v49 = vadd.f32 1e-05, %v598_v47  ;;  %v599_v50 = vmul.f32 0.025, %v597_v48 }
 0x4e7   : > { %980 = vrsqrt.f32 %v600_v49  ;;  %v601_v51 = vadd.f32 1e-05, %v599_v50 }
 0x4e9   : > { %982 = vrsqrt.f32 %v601_v51 }
 0x4f1   : > { %v981_v52 = vpop.eup %980 }
 0x4f2   : > { %v604_v54 = vmul.f32 %v981_v52, %v590_v42 }
 0x4f3   : > { %v983_v55 = vpop.eup %982 }
 0x4f4   : > { %v610_v56 = vmul.f32 %v790_v53, %v604_v54  ;;  %v605_v57 = vmul.f32 %v983_v55, %v591_v44 }
 0x4f6   : > { %v611_v58 = vmul.f32 %v790_v53, %v605_v57  ;;  %v616_v59 = vadd.f32 %v791_v7, %v610_v56  ;;  %635 = sbr.rel (!%p1530_p1) target bundleno = 1305 (0x519), region = 56 }
 0x4f8   : > { %v617_v60 = vadd.f32 %v791_v7, %v611_v58 }
 0x4fa   : > { %v814_v61 = vpack.c.bf16 %v617_v60, %v616_v59 }
 0x4fc   : > { %815 = vst [vmem:[%s263_s26] sm:$0xff] %v814_v61  }
 0x4fd   : > { %s1540_s30 = smov (!%p638_p2, %s637_s30), 2 }
 0x4fe   : > { %s1447_s20 = sshll.u32 %s1540_s30, 6 }
 0x4ff   : > { %s642_s22 = ssub.s32 128, %s1447_s20 }
 0x500   : > { %643 = vsyncadd %s629_s29, %s642_s22  ;;  %p797_p3 = scmp.ne.s32.totalorder %s1447_s20, 0  ;;  %s806_s9 = sshll.u32 %s1231_s19, 7 }
 0x501   : > { %s1457_s24 = scalar_lea.hbm %s1509_s4, %s806_s9  ;;  %s648_s14 = sshll.u32 %s263_s26, 4  ;;  %s1459_s14 = int_to_ptr.vmem [resolvable:$true] %s648_s14 }
 0x502   : > { %s1096_s10 = scalar_lea.vmem %s1459_s14, %s1447_s20  ;;  %s1182_s23 = smov [#allocation10]  }
 0x503   : > { %p1097_p6 = scmp.ne.s32.totalorder %s1459_s14, %s1096_s10  ;;  %s1100_s11 = sshll.u32 %s1182_s23, 4  ;;  %s1101_s11 = int_to_ptr.vmem [resolvable:$false] %s1100_s11 }
 0x504   : > { %s1102_s19 = scalar_lea.vmem %s1101_s11, 256  ;;  %p1103_p13 = scmp.lt.s32.totalorder %s1459_s14, %s1101_s11 }
 0x505   : > { %p1098_p5 = pnand %p1097_p6, %p797_p3  ;;  %p1104_p11 = scmp.lt.s32.totalorder %s1102_s19, %s1096_s10 }
 0x507   : > { %p1099_p12 = pneg %p1098_p5  ;;  %p1105_p7 = por %p1104_p11, %p1103_p13 }
 0x509   : > { %p1106_p0 = pnand %p1105_p7, %p1099_p12 }
 0x50b   : > { %1109 = shalt.err (!%p1106_p0)
}
 0x50c   : > { %s1110_s25 = scalar_lea.hbm %s1457_s24, %s1447_s20  ;;  %s1114_s7 = scalar_lea.hbm %s1509_s4, 192 }
 0x50d   : > { %p1111_p8 = scmp.ne.s32.totalorder %s1457_s24, %s1110_s25  ;;  %p1115_p1 = scmp.lt.u32.totalorder %s1457_s24, %s1509_s4 }
 0x50e   : > { %p1116_p2 = scmp.lt.u32.totalorder %s1114_s7, %s1110_s25  ;;  %p1118_p5 = scmp.lt.u32.totalorder %s1110_s25, %s1457_s24 }
 0x50f   : > { %p1112_p9 = pnand %p1111_p8, %p797_p3 }
 0x510   : > { %p1117_p6 = por %p1116_p2, %p1115_p1 }
 0x511   : > { %p1113_p10 = pneg %p1112_p9 }
 0x512   : > { %p1119_p12 = por %p1118_p5, %p1117_p6 }
 0x514   : > { %p1120_p13 = pnand %p1119_p12, %p1113_p10 }
 0x516   : > { %1123 = shalt.err (!%p1120_p13)
}
 0x517   : > { %s1183_s8 = smov 64   ;;  %s1184_s30 = smov 4  }
 0x518   : > { %654 = dma.vmem_to_hbm [thread:$0]  (%p797_p3), %s1459_s14, %s1447_s20, %s1457_s24, %s629_s29, %s1183_s8, %s1183_s8, %s1184_s30  }
 0x519 PF: > { %s663_s22 = sand.u32 1, %s1158_s15   ;;  %p1531_p11 = scmp.ne.s32.totalorder %s1518_s28, 0 }
 0x51a   : > { %s664_s9 = scalar_lea.sflag [#allocation4], %s663_s22 }
 0x51b   : > { %p899_p7 = pnand %p755_p4, %p1531_p11 }
 0x51d   : > { %1153 = dma.done.wait (!%p899_p7), %s664_s9, 128  }
 0x51e   : > { %1155 = vsyncadd (!%p899_p7), %s664_s9, 4294967168  ;;  %s1532_s27 = sld [smem:[#allocation15_spill]]  ;;  %p19_p0 = scmp.ge.s32.totalorder %s1235_s21, 4  }
 0x51f   : > { %s1533_s15 = smov %s1162_s16  ;;  %s1534_s16 = smov %s1166_s17 }
 0x520   : > { %s1536_s18 = smov %s1235_s21  ;;  %21 = sbr.rel (!%p19_p0) target bundleno = 9 (0x9), region = 93 }
 0x524   : > { %s1535_s17 = smov %s1532_s27 }
 0x527   :  { %669 = vsyncpa [#allocation3], 1 }
 0x528   :  { %671 = vsyncpa [#allocation3 + $0x1], 1 }
 0x529   :  { %672 = vsyncpa [#allocation6], 1 }
 0x52a   :  { %673 = vsyncpa [#allocation9], 1 }
 0x52b   :  { %674 = vsyncpa [#allocation4], 1 }
 0x52c   :  { %676 = vsyncpa [#allocation4 + $0x1], 1 }

// kernel: tpu_custom_call.1
= control target key start
LH: loop header
LB: loop body
LE: loop exit
PB: predicated region body
PF: predicated region fallthrough
CT: control target
= control target key end

     0   :  { %s1505_s0 = inlined_call_operand.hbm [shape: bf16[18,128], index: 0, kind: input, shape index: {}]   ;;  %s1506_s1 = inlined_call_operand.hbm [shape: f32[8,128], index: 1, kind: input, shape index: {}]   ;;  %s1507_s2 = inlined_call_operand.hbm [shape: bf16[128,128], index: 2, kind: input, shape index: {}]   ;;  %s1508_s3 = inlined_call_operand.hbm [shape: bf16[128,128], index: 3, kind: input, shape index: {}]   ;;  %s1509_s4 = inlined_call_operand.hbm [shape: bf16[18,128], index: 4, kind: output, shape index: {}]  }
   0x1   :  { %1513 = sst [smem:[#allocation16_spill]] %s1506_s1 }
   0x2   :  { %9 = vsyncpa [#allocation3], 0 }
   0x3   :  { %11 = vsyncpa [#allocation3 + $0x1], 0 }
   0x4   :  { %12 = vsyncpa [#allocation6], 0 }
   0x5   :  { %13 = vsyncpa [#allocation9], 0 }
   0x6   :  { %14 = vsyncpa [#allocation4], 0 }
   0x7   :  { %16 = vsyncpa [#allocation4 + $0x1], 0  ;;  %s1210_s15 = smov 0   ;;  %s1212_s16 = smov 0  }
   0x8   :  { %s1214_s17 = smov 0   ;;  %s1216_s18 = smov 0  }
   0x9 LB: > { %s1231_s19 = sadd.s32 4294967295, %s1170_s18   ;;  %s750_s20 = sadd.s32 4294967294, %s1170_s18   ;;  %s1170_s18 = sphi %s1216_s18, %s1536_s18   ;;  %s1166_s17 = sphi %s1214_s17, %s1535_s17   ;;  %s1162_s16 = sphi %s1212_s16, %s1534_s16   ;;  %s1158_s15 = sphi %s1210_s15, %s1533_s15  }
   0xa   : > { %s1235_s21 = sadd.s32 1, %s1170_s18   ;;  %s29_s22 = sadd.s32 1, %s1166_s17 }
   0xb   : > { %s26_s23 = ssub.s32 %s1170_s18, %s1235_s21  ;;  %p36_p0 = scmp.ne.s32.totalorder %s1166_s17, %s1162_s16 }
   0xc   : > { %p27_p1 = scmp.eq.s32.totalorder %s26_s23, 0  ;;  %p37_p2 = scmp.eq.s32.totalorder %s1170_s18, 0 }
   0xd   : > { %p42_p3 = scmp.ne.s32.totalorder %s1162_s16, %s1158_s15  ;;  %p1510_p4 = scmp.eq.s32.totalorder %s1231_s19, 0 }
   0xe   : > { %s1247_s24 = scalar_select %p27_p1, %s1166_s17, %s29_s22  }
   0xf   : > { %p1249_p5 = por %p37_p2, %p36_p0  ;;  %p1255_p6 = por %p1510_p4, %p42_p3 }
  0x10   : > { %1514 = sst [smem:[#allocation15_spill]] %s1247_s24  ;;  %p129_p7 = scmp.eq.s32.totalorder %s1231_s19, 1 }
  0x11   : > { %s1515_s25 = scalar_select %p1249_p5, 1, 0 }
  0x12   : > { %s1516_s26 = scalar_select %p1255_p6, 1, 0 }
  0x13   : > { %p135_p8 = scmp.eq.s32.totalorder %s750_s20, 1  ;;  %p751_p9 = scmp.ge.s32.totalorder %s1170_s18, 1 }
  0x14   : > { %p142_p10 = scmp.lt.s32.totalorder %s1170_s18, 3  ;;  %p1262_p11 = por %p129_p7, %p36_p0 }
  0x15   : > { %p1266_p12 = por %p135_p8, %p42_p3  ;;  %s1172_s30 = smov [#allocation5]  }
  0x16   : > { %s1517_s27 = scalar_select %p1262_p11, 1, 0 }
  0x17   : > { %s1518_s28 = scalar_select %p1266_p12, 1, 0 }
  0x18   : > { %p1270_p13 = pnand %p751_p9, %p142_p10  ;;  %s155_s5 = sshll.u32 %s1172_s30, 4  ;;  %s156_s5 = int_to_ptr.vmem [resolvable:$true] %s155_s5 }
  0x19   : > { %s1173_s6 = smov [#allocation7]   ;;  %s1521_s1 = sld [smem:[#allocation16_spill]] }
  0x1a   : > { %s1519_s29 = scalar_select %p1270_p13, 1, 0 }
  0x1b   : > { %p888_p1 = pneg %p1270_p13  ;;  %s165_s7 = sshll.u32 %s1173_s6, 4  ;;  %s1282_s7 = int_to_ptr.vmem [resolvable:$true] %s165_s7 }
  0x1d   : > { %p1278_p0 = pnand %p888_p1, %p1510_p4 }
  0x1f   : > { %s984_s11 = scalar_lea.hbm %s1521_s1, 128  ;;  %p1292_p3 = pneg %p1278_p0 }
  0x20   : > { %p985_p2 = scmp.ne.s32.totalorder %s1521_s1, %s984_s11  ;;  %p991_p9 = scmp.lt.u32.totalorder %s984_s11, %s1521_s1 }
  0x22   : > { %p987_p7 = pnand %p1292_p3, %p985_p2 }
  0x24   : > { %p988_p8 = pneg %p987_p7 }
  0x26   : > { %p993_p10 = pnand %p991_p9, %p988_p8 }
  0x28   : > { %996 = shalt.err (!%p993_p10)
}
  0x29   : > { %s997_s23 = scalar_lea.vmem %s156_s5, 128  ;;  %p1005_p11 = scmp.lt.s32.totalorder %s156_s5, %s156_s5 }
  0x2a   : > { %p998_p1 = scmp.ne.s32.totalorder %s156_s5, %s997_s23  ;;  %p1006_p6 = scmp.lt.s32.totalorder %s997_s23, %s997_s23 }
  0x2c   : > { %p1000_p4 = pnand %p998_p1, %p1292_p3  ;;  %p1007_p13 = por %p1006_p6, %p1005_p11 }
  0x2e   : > { %p1001_p12 = pneg %p1000_p4 }
  0x30   : > { %p1008_p5 = pnand %p1007_p13, %p1001_p12 }
  0x32   : > { %1011 = shalt.err (!%p1008_p5)
}
  0x33   : > { %891 = dma.hbm_to_vmem [thread:$0]  (!%p1278_p0), %s1521_s1, 128, %s156_s5, [#allocation6]  }
  0x34   : > { %s1012_s11 = scalar_lea.hbm %s1507_s2, 1024 }
  0x35   : > { %p1013_p4 = scmp.ne.s32.totalorder %s1507_s2, %s1012_s11  ;;  %p1019_p5 = scmp.lt.u32.totalorder %s1012_s11, %s1507_s2 }
  0x37   : > { %p1015_p2 = pnand %p1013_p4, %p1292_p3 }
  0x39   : > { %p1016_p6 = pneg %p1015_p2 }
  0x3b   : > { %p1021_p11 = pnand %p1019_p5, %p1016_p6 }
  0x3d   : > { %1024 = shalt.err (!%p1021_p11)
}
  0x3e   : > { %s1025_s5 = scalar_lea.vmem %s1282_s7, 1024  ;;  %p1033_p8 = scmp.lt.s32.totalorder %s1282_s7, %s1282_s7 }
  0x3f   : > { %p1026_p12 = scmp.ne.s32.totalorder %s1282_s7, %s1025_s5  ;;  %p1034_p9 = scmp.lt.s32.totalorder %s1025_s5, %s1025_s5 }
  0x41   : > { %p1028_p13 = pnand %p1026_p12, %p1292_p3  ;;  %p1035_p10 = por %p1034_p9, %p1033_p8 }
  0x43   : > { %p1029_p7 = pneg %p1028_p13 }
  0x45   : > { %p1036_p1 = pnand %p1035_p10, %p1029_p7 }
  0x47   : > { %1039 = shalt.err (!%p1036_p1)
}
  0x48   : > { %s1174_s23 = smov 64   ;;  %s1175_s30 = smov 4  }
  0x49   : > { %894 = dma.hbm_to_vmem [thread:$0]  (!%p1278_p0), %s1507_s2, 1024, %s1282_s7, [#allocation6], %s1174_s23, %s1174_s23, %s1175_s30  }
  0x4a   : > { %s1176_s10 = smov [#allocation8]   ;;  %s1040_s20 = scalar_lea.hbm %s1508_s3, 1024 }
  0x4b   : > { %s178_s11 = sshll.u32 %s1176_s10, 4  ;;  %p1041_p4 = scmp.ne.s32.totalorder %s1508_s3, %s1040_s20  ;;  %s179_s11 = int_to_ptr.vmem [resolvable:$true] %s178_s11 }
  0x4c   : > { %p1047_p5 = scmp.lt.u32.totalorder %s1040_s20, %s1508_s3 }
  0x4d   : > { %p1043_p2 = pnand %p1041_p4, %p1292_p3 }
  0x4f   : > { %p1044_p6 = pneg %p1043_p2 }
  0x51   : > { %p1049_p11 = pnand %p1047_p5, %p1044_p6 }
  0x53   : > { %1052 = shalt.err (!%p1049_p11)
}
  0x54   : > { %s1053_s7 = scalar_lea.vmem %s179_s11, 1024  ;;  %p1061_p8 = scmp.lt.s32.totalorder %s179_s11, %s179_s11 }
  0x55   : > { %p1054_p12 = scmp.ne.s32.totalorder %s179_s11, %s1053_s7  ;;  %p1062_p9 = scmp.lt.s32.totalorder %s1053_s7, %s1053_s7 }
  0x57   : > { %p1056_p13 = pnand %p1054_p12, %p1292_p3  ;;  %p1063_p10 = por %p1062_p9, %p1061_p8 }
  0x59   : > { %p1057_p7 = pneg %p1056_p13 }
  0x5b   : > { %p1064_p1 = pnand %p1063_p10, %p1057_p7 }
  0x5d   : > { %1067 = shalt.err (!%p1064_p1)
}
  0x5e   : > { %897 = dma.hbm_to_vmem [thread:$0]  (!%p1278_p0), %s1508_s3, 1024, %s179_s11, [#allocation9], %s1174_s23, %s1174_s23, %s1175_s30  }
  0x5f   : > { %p755_p4 = scmp.ge.s32.totalorder %s1170_s18, 2 }
  0x60   : > { %p1523_p2 = scmp.ne.s32.totalorder (!%p755_p4), %s1515_s25, 0 }
  0x61   : > { %188 = sbr.rel (%p755_p4) target bundleno = 139 (0x8b), region = 28 }
  0x68   : > { %191 = sbr.rel (!%p1523_p2) target bundleno = 139 (0x8b), region = 32  ;;  %s192_s1 = sand.u32 (%p1523_p2), 1, %s1166_s17  }
  0x69   : > { %s757_s24 = sshll.u32 (%p1523_p2), %s1170_s18, 1  ;;  %s756_s14 = sshll.u32 (%p1523_p2), %s192_s1, 3 }
  0x6a   : > { %s198_s10 = ssub.s32 (%p1523_p2), 3, %s757_s24  ;;  %s1359_s30 = scalar_lea.sflag (%p1523_p2), [#allocation3], %s192_s1 }
  0x6b   : > { %p199_p3 = scmp.lt.s32.totalorder (%p1523_p2), %s198_s10, 2  ;;  %s196_s11 = scalar_lea.vmem (%p1523_p2), [#allocation2], %s756_s14 }
  0x6f   : > { %s1538_s10 = smov (!%p199_p3, %s198_s10), 2 }
  0x70   : > { %s1356_s8 = sshll.u32 %s1538_s10, 6 }
  0x71   : > { %s203_s23 = ssub.s32 128, %s1356_s8 }
  0x72   : > { %204 = vsyncadd %s1359_s30, %s203_s23  ;;  %p759_p0 = scmp.ne.s32.totalorder %s1356_s8, 0  ;;  %s803_s25 = sshll.u32 %s1170_s18, 7 }
  0x73   : > { %s1367_s20 = scalar_lea.hbm %s1505_s0, %s803_s25  ;;  %s209_s22 = sshll.u32 %s196_s11, 4  ;;  %s1369_s22 = int_to_ptr.vmem [resolvable:$true] %s209_s22 }
  0x74   : > { %s1068_s5 = scalar_lea.hbm %s1367_s20, %s1356_s8  ;;  %s1072_s9 = scalar_lea.hbm %s1505_s0, 192 }
  0x75   : > { %p1069_p6 = scmp.ne.s32.totalorder %s1367_s20, %s1068_s5  ;;  %p1073_p12 = scmp.lt.u32.totalorder %s1367_s20, %s1505_s0 }
  0x76   : > { %p1074_p13 = scmp.lt.u32.totalorder %s1072_s9, %s1068_s5  ;;  %p1076_p8 = scmp.lt.u32.totalorder %s1068_s5, %s1367_s20 }
  0x77   : > { %p1070_p5 = pnand %p1069_p6, %p759_p0 }
  0x78   : > { %p1075_p7 = por %p1074_p13, %p1073_p12 }
  0x79   : > { %p1071_p11 = pneg %p1070_p5 }
  0x7a   : > { %p1077_p9 = por %p1076_p8, %p1075_p7 }
  0x7c   : > { %p1078_p10 = pnand %p1077_p9, %p1071_p11 }
  0x7e   : > { %1081 = shalt.err (!%p1078_p10)
}
  0x7f   : > { %s1082_s14 = scalar_lea.vmem %s1369_s22, %s1356_s8  ;;  %s1177_s10 = smov [#allocation2]  }
  0x80   : > { %p1083_p1 = scmp.ne.s32.totalorder %s1369_s22, %s1082_s14  ;;  %s1086_s23 = sshll.u32 %s1177_s10, 4  ;;  %s1087_s23 = int_to_ptr.vmem [resolvable:$false] %s1086_s23 }
  0x81   : > { %s1088_s11 = scalar_lea.vmem %s1087_s23, 256  ;;  %p1089_p6 = scmp.lt.s32.totalorder %s1369_s22, %s1087_s23 }
  0x82   : > { %p1084_p2 = pnand %p1083_p1, %p759_p0  ;;  %p1090_p5 = scmp.lt.s32.totalorder %s1088_s11, %s1082_s14 }
  0x84   : > { %p1085_p3 = pneg %p1084_p2  ;;  %p1091_p12 = por %p1090_p5, %p1089_p6 }
  0x86   : > { %p1092_p13 = pnand %p1091_p12, %p1085_p3 }
  0x88   : > { %1095 = shalt.err (!%p1092_p13)
}
  0x89   : > { %s1178_s25 = smov 64   ;;  %s1179_s12 = smov 4  }
  0x8a   : > { %215 = dma.hbm_to_vmem [thread:$0]  (%p759_p0), %s1367_s20, %s1356_s8, %s1369_s22, %s1359_s30, %s1178_s25, %s1178_s25, %s1179_s12  }
  0x8b PF: > { %p1524_p11 = scmp.ne.s32.totalorder %s1519_s29, 0 }
  0x8c   : > { %s1399_s13 = sand.u32 (!%p1524_p11), 1, %s1162_s16   ;;  %p1525_p7 = scmp.ne.s32.totalorder (!%p1524_p11), %s1516_s26, 0 }
  0x8d   : > { %221 = sbr.rel (%p1524_p11) target bundleno = 1305 (0x519), region = 36  ;;  %s764_s5 = sshll.u32 (!%p1524_p11), %s1399_s13, 3 }
  0x8e   : > { %s224_s7 = scalar_lea.sflag (!%p1524_p11), [#allocation3], %s1399_s13  ;;  %s227_s6 = scalar_lea.vmem (!%p1524_p11), [#allocation2], %s764_s5 }
  0x94   : > { %1141 = dma.done.wait (%p1525_p7), %s224_s7, 128  }
  0x95   : > { %1143 = vsyncadd (%p1525_p7), %s224_s7, 4294967168  ;;  %p1526_p0 = scmp.eq.s32.totalorder %s1231_s19, 0 }
  0x97   : > { %1145 = dma.done.wait (%p1526_p0), [#allocation6], 1152   ;;  %p1527_p8 = pmov %p1526_p0 }
  0x98   : > { %p1528_p9 = pmov %p1526_p0 }
  0x99   : > { %1147 = vsyncadd (%p1527_p8), [#allocation6], 4294966144 }
  0x9a   : > { %1149 = dma.done.wait (%p1528_p9), [#allocation9], 1024   ;;  %p1529_p10 = pmov %p1526_p0 }
  0x9b   : > { %v808_v0 = vld [vmem:[%s227_s6] sm:$0xff]   ;;  %v952_v3 = vld [vmem:[#allocation7] sm:$0xff]   ;;  %v1180_v4 = vmov 0.0   ;;  %v1420_v7 = vld [vmem:[#allocation5 + $0x6] ss:$0 sm:$0xff]  ;;  %vm1181_vm0 = vmmov 0  }
  0x9c   : > { %1151 = vsyncadd (%p1529_p10), [#allocation9], 4294966272  ;;  %v809_v1 = vunpack.c.l.bf16 %v808_v0  ;;  %v810_v2 = vunpack.c.h.bf16 %v808_v0  ;;  %834 = vmatprep.subr.bf16.mxu0 %v1180_v4  ;;  %854 = vmatprep.subr.bf16.mxu1 %v1180_v4  ;;  %v953_v16 = vld [vmem:[#allocation7 + $0x8] sm:$0xff]   ;;  %v954_v17 = vld [vmem:[#allocation7 + $0x10] sm:$0xff]   ;;  %s263_s26 = scalar_lea.vmem [#allocation10], %s764_s5  ;;  %s629_s29 = scalar_lea.sflag [#allocation4], %s1399_s13 }
  0x9d   : > { %835 = vmatpush3.bf16.msra.mxu0 %v952_v3  ;;  %v955_v18 = vld [vmem:[#allocation7 + $0x18] sm:$0xff]   ;;  %v956_v19 = vld [vmem:[#allocation7 + $0x20] sm:$0xff]   ;;  %850 = vmatprep.mubr.msk.bf16.mxu0 %vm1181_vm0, %v1180_v4  ;;  %v957_v20 = vld [vmem:[#allocation7 + $0x28] sm:$0xff]   ;;  %p1530_p1 = scmp.ne.s32.totalorder %s1517_s27, 0 }
  0x9e   : > { %286 = vadd.xlane.f32.xlu0 %v809_v1  ;;  %836 = vmatprep.subr.bf16.mxu0 %v1180_v4  ;;  %v958_v21 = vld [vmem:[#allocation7 + $0x30] sm:$0xff]   ;;  %v959_v22 = vld [vmem:[#allocation7 + $0x38] sm:$0xff]   ;;  %v960_v40 = vld [vmem:[#allocation8] sm:$0xff]   ;;  %s795_s8 = sshll.u32 (%p1530_p1), %s1231_s19, 1 }
  0x9f   : > { %870 = vmatprep.mubr.msk.bf16.mxu1 %vm1181_vm0, %v1180_v4  ;;  %v770_v31 = vld [vmem:[#allocation5] ss:$0 sm:$0xff]  ;;  %v771_v35 = vld [vmem:[#allocation5 + $0x1] ss:$0 sm:$0xff]  ;;  %855 = vmatpush3.bf16.msra.mxu1 %v960_v40  ;;  %v961_v41 = vld [vmem:[#allocation8 + $0x8] sm:$0xff]   ;;  %s637_s30 = ssub.s32 (%p1530_p1), 3, %s795_s8 }
  0xa0   : > { %856 = vmatprep.subr.bf16.mxu1 %v1180_v4  ;;  %v962_v42 = vld [vmem:[#allocation8 + $0x10] sm:$0xff]   ;;  %v963_v43 = vld [vmem:[#allocation8 + $0x18] sm:$0xff]   ;;  %v964_v44 = vld [vmem:[#allocation8 + $0x20] sm:$0xff]   ;;  %p638_p2 = scmp.lt.s32.totalorder (%p1530_p1), %s637_s30, 2 }
  0xa1   : > { %837 = vmatpush3.bf16.msra.mxu0 %v953_v16  ;;  %v965_v45 = vld [vmem:[#allocation8 + $0x28] sm:$0xff]   ;;  %v966_v46 = vld [vmem:[#allocation8 + $0x30] sm:$0xff]   ;;  %v967_v47 = vld [vmem:[#allocation8 + $0x38] sm:$0xff]  }
  0xa2   : > { %288 = vadd.xlane.f32.xlu0 %v810_v2  ;;  %838 = vmatprep.subr.bf16.mxu0 %v1180_v4  ;;  %v772_v48 = vld [vmem:[#allocation5 + $0x2] ss:$0 sm:$0xff] }
  0xa3   : > { %857 = vmatpush3.bf16.msra.mxu1 %v961_v41 }
  0xa4   : > { %858 = vmatprep.subr.bf16.mxu1 %v1180_v4 }
  0xa5   : > { %839 = vmatpush3.bf16.msra.mxu0 %v954_v17 }
  0xa6   : > { %840 = vmatprep.subr.bf16.mxu0 %v1180_v4 }
  0xa7   : > { %859 = vmatpush3.bf16.msra.mxu1 %v962_v42 }
  0xa8   : > { %860 = vmatprep.subr.bf16.mxu1 %v1180_v4 }
  0xa9   : > { %841 = vmatpush3.bf16.msra.mxu0 %v955_v18 }
  0xaa   : > { %842 = vmatprep.subr.bf16.mxu0 %v1180_v4 }
  0xab   : > { %861 = vmatpush3.bf16.msra.mxu1 %v963_v43 }
  0xac   : > { %862 = vmatprep.subr.bf16.mxu1 %v1180_v4 }
  0xad   : > { %843 = vmatpush3.bf16.msra.mxu0 %v956_v19 }
  0xae   : > { %844 = vmatprep.subr.bf16.mxu0 %v1180_v4 }
  0xaf   : > { %863 = vmatpush3.bf16.msra.mxu1 %v964_v44 }
  0xb0   : > { %864 = vmatprep.subr.bf16.mxu1 %v1180_v4 }
  0xb1   : > { %845 = vmatpush3.bf16.msra.mxu0 %v957_v20 }
  0xb2   : > { %846 = vmatprep.subr.bf16.mxu0 %v1180_v4 }
  0xb3   : > { %865 = vmatpush3.bf16.msra.mxu1 %v965_v45 }
  0xb4   : > { %866 = vmatprep.subr.bf16.mxu1 %v1180_v4 }
  0xb5   : > { %847 = vmatpush3.bf16.msra.mxu0 %v958_v21 }
  0xb6   : > { %848 = vmatprep.subr.bf16.mxu0 %v1180_v4 }
  0xb7   : > { %867 = vmatpush3.bf16.msra.mxu1 %v966_v46 }
  0xb8   : > { %868 = vmatprep.subr.bf16.mxu1 %v1180_v4 }
  0xb9   : > { %849 = vmatpush3.bf16.msra.mxu0 %v959_v22 }
  0xbb   : > { %869 = vmatpush3.bf16.msra.mxu1 %v967_v47 }
 0x12b   : > { %v287_v5 = vpop.xlane.xlu0 %286 }
 0x12c   : > { %v290_v6 = vmul.f32 0.025, %v287_v5 }
 0x12e   : > { %v292_v8 = vsub.f32 %v809_v1, %v290_v6 }
 0x12f   : > { %v289_v9 = vpop.xlane.xlu0 %288 }
 0x130   : > { %v291_v10 = vmul.f32 0.025, %v289_v9  ;;  %v298_v11 = vmul.f32 %v1420_v7, %v292_v8 }
 0x132   : > { %v293_v12 = vsub.f32 %v810_v2, %v291_v10  ;;  %v300_v13 = vmul.f32 %v298_v11, %v298_v11 }
 0x134   : > { %302 = vadd.xlane.f32.xlu1 %v300_v13  ;;  %v299_v14 = vmul.f32 %v1420_v7, %v293_v12 }
 0x136   : > { %v301_v15 = vmul.f32 %v299_v14, %v299_v14 }
 0x138   : > { %304 = vadd.xlane.f32.xlu1 %v301_v15 }
 0x1c1   : > { %v303_v23 = vpop.xlane.xlu1 %302 }
 0x1c2   : > { %v306_v24 = vmul.f32 0.025, %v303_v23 }
 0x1c4   : > { %v308_v25 = vadd.f32 1e-05, %v306_v24 }
 0x1c5   : > { %v305_v26 = vpop.xlane.xlu1 %304 }
 0x1c6   : > { %968 = vrsqrt.f32 %v308_v25  ;;  %v307_v27 = vmul.f32 0.025, %v305_v26 }
 0x1c8   : > { %v309_v28 = vadd.f32 1e-05, %v307_v27 }
 0x1ca   : > { %970 = vrsqrt.f32 %v309_v28 }
 0x1d0   : > { %v969_v29 = vpop.eup %968 }
 0x1d1   : > { %v312_v30 = vmul.f32 %v969_v29, %v298_v11  ;;  %v781_v11 = vld [vmem:[#allocation5 + $0x3] ss:$0 sm:$0xff] }
 0x1d3   : > { %v318_v34 = vmul.f32 %v770_v31, %v312_v30 }
 0x1d4   : > { %v971_v32 = vpop.eup %970 }
 0x1d5   : > { %v313_v33 = vmul.f32 %v971_v32, %v299_v14  ;;  %v324_v37 = vadd.f32 %v771_v35, %v318_v34 }
 0x1d7   : > { %v319_v36 = vmul.f32 %v770_v31, %v313_v33 }
 0x1d9   : > { %v325_v38 = vadd.f32 %v771_v35, %v319_v36 }
 0x1db   : > { %v326_v39 = vpack.c.bf16 %v325_v38, %v324_v37 }
 0x1dd   : > { %851 = vmatmul.mubr.bf16.vlgmr.msra.gmra.mrb[0].mxu0 %v326_v39 }
 0x2b0   : > { %v429_v49 = vpop.f32.mrb[0].mxu0 }
 0x2b1   : > { %v430_v50 = vadd.f32 %v772_v48, %v429_v49  ;;  %v852_v51 = vpop.f32.mrb[1].mxu0 }
 0x2b2   : > { %v432_v52 = vpop.f32.mrb[2].mxu0 }
 0x2b3   : > { %v438_v53 = vmul.f32 0.044715, %v430_v50  ;;  %v433_v54 = vadd.f32 %v772_v48, %v432_v52  ;;  %v853_v55 = vpop.f32.mrb[3].mxu0  ;;  %v436_v4 = vmul.f32 0.5, %v430_v50 }
 0x2b5   : > { %v440_v56 = vmul.f32 %v438_v53, %v430_v50  ;;  %v439_v57 = vmul.f32 0.044715, %v433_v54  ;;  %v437_v5 = vmul.f32 0.5, %v433_v54  ;;  %v790_v53 = vld [vmem:[#allocation5 + $0x4] ss:$0 sm:$0xff] }
 0x2b7   : > { %v442_v58 = vmul.f32 %v440_v56, %v430_v50  ;;  %v441_v59 = vmul.f32 %v439_v57, %v433_v54 }
 0x2b9   : > { %v443_v60 = vmul.f32 %v441_v59, %v433_v54  ;;  %v444_v61 = vadd.f32 %v442_v58, %v430_v50 }
 0x2bb   : > { %v445_v62 = vadd.f32 %v443_v60, %v433_v54  ;;  %v446_v63 = vmul.f32 0.7978846, %v444_v61 }
 0x2bd   : > { %v447_v0 = vmul.f32 0.7978846, %v445_v62  ;;  %972 = vtanh.f32 %v446_v63 }
 0x2bf   : > { %974 = vtanh.f32 %v447_v0 }
 0x2c7   : > { %v973_v1 = vpop.eup %972 }
 0x2c8   : > { %v450_v2 = vadd.f32 1.0, %v973_v1 }
 0x2c9   : > { %v975_v3 = vpop.eup %974 }
 0x2ca   : > { %v451_v6 = vadd.f32 1.0, %v975_v3  ;;  %v452_v8 = vmul.f32 %v450_v2, %v436_v4 }
 0x2cc   : > { %v453_v9 = vmul.f32 %v451_v6, %v437_v5 }
 0x2ce   : > { %v454_v10 = vpack.c.bf16 %v453_v9, %v452_v8 }
 0x2d0   : > { %871 = vmatmul.mubr.bf16.vlgmr.msra.gmra.mrb[0].mxu1 %v454_v10 }
 0x3a3   : > { %v557_v12 = vpop.f32.mrb[0].mxu1 }
 0x3a4   : > { %v558_v13 = vadd.f32 %v781_v11, %v557_v12  ;;  %v872_v14 = vpop.f32.mrb[1].mxu1 }
 0x3a5   : > { %v560_v15 = vpop.f32.mrb[2].mxu1 }
 0x3a6   : > { %v566_v16 = vmul.f32 0.044715, %v558_v13  ;;  %v561_v17 = vadd.f32 %v781_v11, %v560_v15  ;;  %v873_v18 = vpop.f32.mrb[3].mxu1  ;;  %v564_v29 = vmul.f32 0.5, %v558_v13 }
 0x3a8   : > { %v567_v19 = vmul.f32 0.044715, %v561_v17  ;;  %v568_v20 = vmul.f32 %v566_v16, %v558_v13  ;;  %v565_v33 = vmul.f32 0.5, %v561_v17 }
 0x3aa   : > { %v570_v21 = vmul.f32 %v568_v20, %v558_v13  ;;  %v569_v22 = vmul.f32 %v567_v19, %v561_v17 }
 0x3ac   : > { %v572_v23 = vadd.f32 %v570_v21, %v558_v13  ;;  %v571_v24 = vmul.f32 %v569_v22, %v561_v17 }
 0x3ae   : > { %v574_v25 = vmul.f32 0.7978846, %v572_v23  ;;  %v573_v26 = vadd.f32 %v571_v24, %v561_v17 }
 0x3b0   : > { %976 = vtanh.f32 %v574_v25  ;;  %v575_v27 = vmul.f32 0.7978846, %v573_v26 }
 0x3b2   : > { %978 = vtanh.f32 %v575_v27 }
 0x3ba   : > { %v977_v28 = vpop.eup %976 }
 0x3bb   : > { %v578_v30 = vadd.f32 1.0, %v977_v28 }
 0x3bc   : > { %v979_v31 = vpop.eup %978 }
 0x3bd   : > { %v580_v32 = vmul.f32 %v578_v30, %v564_v29  ;;  %v579_v34 = vadd.f32 1.0, %v979_v31 }
 0x3bf   : > { %582 = vadd.xlane.f32.xlu0 %v580_v32  ;;  %v581_v35 = vmul.f32 %v579_v34, %v565_v33 }
 0x3c1   : > { %584 = vadd.xlane.f32.xlu1 %v581_v35 }
 0x44c   : > { %v583_v36 = vpop.xlane.xlu0 %582 }
 0x44d   : > { %v586_v37 = vmul.f32 0.025, %v583_v36 }
 0x44e   : > { %v585_v38 = vpop.xlane.xlu1 %584 }
 0x44f   : > { %v588_v39 = vsub.f32 %v580_v32, %v586_v37  ;;  %v587_v40 = vmul.f32 0.025, %v585_v38 }
 0x451   : > { %v589_v41 = vsub.f32 %v581_v35, %v587_v40  ;;  %v590_v42 = vmul.f32 %v1420_v7, %v588_v39 }
 0x453   : > { %v592_v43 = vmul.f32 %v590_v42, %v590_v42  ;;  %v591_v44 = vmul.f32 %v1420_v7, %v589_v41  ;;  %v791_v7 = vld [vmem:[#allocation5 + $0x5] ss:$0 sm:$0xff] }
 0x455   : > { %594 = vadd.xlane.f32.xlu0 %v592_v43  ;;  %v593_v45 = vmul.f32 %v591_v44, %v591_v44 }
 0x457   : > { %596 = vadd.xlane.f32.xlu1 %v593_v45 }
 0x4e2   : > { %v595_v46 = vpop.xlane.xlu0 %594 }
 0x4e3   : > { %v598_v47 = vmul.f32 0.025, %v595_v46 }
 0x4e4   : > { %v597_v48 = vpop.xlane.xlu1 %596 }
 0x4e5   : > { %v600_v49 = vadd.f32 1e-05, %v598_v47  ;;  %v599_v50 = vmul.f32 0.025, %v597_v48 }
 0x4e7   : > { %980 = vrsqrt.f32 %v600_v49  ;;  %v601_v51 = vadd.f32 1e-05, %v599_v50 }
 0x4e9   : > { %982 = vrsqrt.f32 %v601_v51 }
 0x4f1   : > { %v981_v52 = vpop.eup %980 }
 0x4f2   : > { %v604_v54 = vmul.f32 %v981_v52, %v590_v42 }
 0x4f3   : > { %v983_v55 = vpop.eup %982 }
 0x4f4   : > { %v610_v56 = vmul.f32 %v790_v53, %v604_v54  ;;  %v605_v57 = vmul.f32 %v983_v55, %v591_v44 }
 0x4f6   : > { %v611_v58 = vmul.f32 %v790_v53, %v605_v57  ;;  %v616_v59 = vadd.f32 %v791_v7, %v610_v56  ;;  %635 = sbr.rel (!%p1530_p1) target bundleno = 1305 (0x519), region = 56 }
 0x4f8   : > { %v617_v60 = vadd.f32 %v791_v7, %v611_v58 }
 0x4fa   : > { %v814_v61 = vpack.c.bf16 %v617_v60, %v616_v59 }
 0x4fc   : > { %815 = vst [vmem:[%s263_s26] sm:$0xff] %v814_v61  }
 0x4fd   : > { %s1540_s30 = smov (!%p638_p2, %s637_s30), 2 }
 0x4fe   : > { %s1447_s20 = sshll.u32 %s1540_s30, 6 }
 0x4ff   : > { %s642_s22 = ssub.s32 128, %s1447_s20 }
 0x500   : > { %643 = vsyncadd %s629_s29, %s642_s22  ;;  %p797_p3 = scmp.ne.s32.totalorder %s1447_s20, 0  ;;  %s806_s9 = sshll.u32 %s1231_s19, 7 }
 0x501   : > { %s1457_s24 = scalar_lea.hbm %s1509_s4, %s806_s9  ;;  %s648_s14 = sshll.u32 %s263_s26, 4  ;;  %s1459_s14 = int_to_ptr.vmem [resolvable:$true] %s648_s14 }
 0x502   : > { %s1096_s10 = scalar_lea.vmem %s1459_s14, %s1447_s20  ;;  %s1182_s23 = smov [#allocation10]  }
 0x503   : > { %p1097_p6 = scmp.ne.s32.totalorder %s1459_s14, %s1096_s10  ;;  %s1100_s11 = sshll.u32 %s1182_s23, 4  ;;  %s1101_s11 = int_to_ptr.vmem [resolvable:$false] %s1100_s11 }
 0x504   : > { %s1102_s19 = scalar_lea.vmem %s1101_s11, 256  ;;  %p1103_p13 = scmp.lt.s32.totalorder %s1459_s14, %s1101_s11 }
 0x505   : > { %p1098_p5 = pnand %p1097_p6, %p797_p3  ;;  %p1104_p11 = scmp.lt.s32.totalorder %s1102_s19, %s1096_s10 }
 0x507   : > { %p1099_p12 = pneg %p1098_p5  ;;  %p1105_p7 = por %p1104_p11, %p1103_p13 }
 0x509   : > { %p1106_p0 = pnand %p1105_p7, %p1099_p12 }
 0x50b   : > { %1109 = shalt.err (!%p1106_p0)
}
 0x50c   : > { %s1110_s25 = scalar_lea.hbm %s1457_s24, %s1447_s20  ;;  %s1114_s7 = scalar_lea.hbm %s1509_s4, 192 }
 0x50d   : > { %p1111_p8 = scmp.ne.s32.totalorder %s1457_s24, %s1110_s25  ;;  %p1115_p1 = scmp.lt.u32.totalorder %s1457_s24, %s1509_s4 }
 0x50e   : > { %p1116_p2 = scmp.lt.u32.totalorder %s1114_s7, %s1110_s25  ;;  %p1118_p5 = scmp.lt.u32.totalorder %s1110_s25, %s1457_s24 }
 0x50f   : > { %p1112_p9 = pnand %p1111_p8, %p797_p3 }
 0x510   : > { %p1117_p6 = por %p1116_p2, %p1115_p1 }
 0x511   : > { %p1113_p10 = pneg %p1112_p9 }
 0x512   : > { %p1119_p12 = por %p1118_p5, %p1117_p6 }
 0x514   : > { %p1120_p13 = pnand %p1119_p12, %p1113_p10 }
 0x516   : > { %1123 = shalt.err (!%p1120_p13)
}
 0x517   : > { %s1183_s8 = smov 64   ;;  %s1184_s30 = smov 4  }
 0x518   : > { %654 = dma.vmem_to_hbm [thread:$0]  (%p797_p3), %s1459_s14, %s1447_s20, %s1457_s24, %s629_s29, %s1183_s8, %s1183_s8, %s1184_s30  }
 0x519 PF: > { %s663_s22 = sand.u32 1, %s1158_s15   ;;  %p1531_p11 = scmp.ne.s32.totalorder %s1518_s28, 0 }
 0x51a   : > { %s664_s9 = scalar_lea.sflag [#allocation4], %s663_s22 }
 0x51b   : > { %p899_p7 = pnand %p755_p4, %p1531_p11 }
 0x51d   : > { %1153 = dma.done.wait (!%p899_p7), %s664_s9, 128  }
 0x51e   : > { %1155 = vsyncadd (!%p899_p7), %s664_s9, 4294967168  ;;  %s1532_s27 = sld [smem:[#allocation15_spill]]  ;;  %p19_p0 = scmp.ge.s32.totalorder %s1235_s21, 4  }
 0x51f   : > { %s1533_s15 = smov %s1162_s16  ;;  %s1534_s16 = smov %s1166_s17 }
 0x520   : > { %s1536_s18 = smov %s1235_s21  ;;  %21 = sbr.rel (!%p19_p0) target bundleno = 9 (0x9), region = 93 }
 0x524   : > { %s1535_s17 = smov %s1532_s27 }
 0x527   :  { %669 = vsyncpa [#allocation3], 1 }
 0x528   :  { %671 = vsyncpa [#allocation3 + $0x1], 1 }
 0x529   :  { %672 = vsyncpa [#allocation6], 1 }
 0x52a   :  { %673 = vsyncpa [#allocation9], 1 }
 0x52b   :  { %674 = vsyncpa [#allocation4], 1 }
 0x52c   :  { %676 = vsyncpa [#allocation4 + $0x1], 1 }

</bundles_post_ra>
